<compile_context>
chip_gen: v6e
topology: v6e:2x2x1
jax: 0.10.0
libtpu: 0.0.40
codegen_flags: <defaults>
</compile_context>

<pallas_src>
import jax
import jax.numpy as jnp
from jax import lax
from jax.experimental import pallas as pl
from jax.experimental.pallas import tpu as pltpu

K = 5          # conv kernel size
PAD = 2        # "same" padding for stride 1
EPS = 1e-5     # BatchNorm eps


def _double_conv5_kernel(x_ref, w1_ref, b1_ref, w2_ref, b2_ref, o_ref,
                         xpad1_ref, xpad2_ref):
    """Whole batch in one invocation, lane-dense merged (rows, W*C) layout.

    x_ref    : (N, H, W*Cin)            unpadded input slabs (f32)
    w1_ref   : (K, W*Cin,  W*Cmid)      banded conv-1 weights, BN-1 scale folded
    b1_ref   : (1, W*Cmid)              folded BN-1 bias (tiled over W)
    w2_ref   : (K, W*Cmid, W*Cout)      banded conv-2 weights, BN-2 scale folded
    b2_ref   : (1, W*Cout)
    o_ref    : (N, H, W*Cout)
    xpad1_ref: VMEM (N*(H+4), W*Cin)  mxu_dtype   row-padded stage-1 input
    xpad2_ref: VMEM (N*(H+4), W*Cmid) mxu_dtype   row-padded stage-2 input
    """
    N = x_ref.shape[0]
    H = x_ref.shape[1]
    Rpad = H + 2 * PAD            # per-element padded row block
    M = N * Rpad - 2 * PAD        # shifted-window output rows computed

    # ---- zero ONLY the halo rows; interiors are fully overwritten below ----
    zero1 = jnp.zeros((PAD, xpad1_ref.shape[1]), xpad1_ref.dtype)
    zero2 = jnp.zeros((PAD, xpad2_ref.shape[1]), xpad2_ref.dtype)
    for n in range(N):
        base = n * Rpad
        xpad1_ref[base:base + PAD, :] = zero1                 # top halo
        xpad1_ref[base + PAD + H:base + Rpad, :] = zero1      # bottom halo
        xpad2_ref[base:base + PAD, :] = zero2
        xpad2_ref[base + PAD + H:base + Rpad, :] = zero2

    # ---- stage-1 interior: cast once into MXU-dtype scratch -----------------
    for n in range(N):
        xpad1_ref[n * Rpad + PAD:n * Rpad + PAD + H, :] = (
            x_ref[n].astype(xpad1_ref.dtype))

    def conv_bias_relu(xpad_ref, w_ref, b_ref):
        # 5 lane-dense matmuls (one per kernel row); BN scale already folded
        # into the band, f32 accumulation.  (On v7x, MRB accumulation would
        # let the MXU do the adds in place; value-accumulation is fine here.)
        acc = jnp.zeros((M, w_ref.shape[2]), jnp.float32)
        for kh in range(K):
            acc = acc + jnp.dot(xpad_ref[kh:kh + M, :], w_ref[kh],
                                preferred_element_type=jnp.float32)
        return jnp.maximum(acc + b_ref[...], 0.0)             # bias + ReLU

    y1 = conv_bias_relu(xpad1_ref, w1_ref, b1_ref)            # (M, W*Cmid) f32

    # ---- stage-2 interior: intermediate never leaves VMEM -------------------
    # Valid rows of element n are y1[n*Rpad : n*Rpad + H]; the 4 rows in
    # between are shifted-window garbage and are discarded.
    for n in range(N):
        xpad2_ref[n * Rpad + PAD:n * Rpad + PAD + H, :] = (
            y1[n * Rpad:n * Rpad + H].astype(xpad2_ref.dtype))

    y2 = conv_bias_relu(xpad2_ref, w2_ref, b2_ref)            # (M, W*Cout) f32

    # Lane-dense output slab (W*Cout = 128 lanes here) -> unmasked stores.
    for n in range(N):
        o_ref[n] = y2[n * Rpad:n * Rpad + H].astype(o_ref.dtype)


def _fold_bn(gamma, beta, mean, var, eps=EPS):
    scale = gamma / jnp.sqrt(var + eps)
    bias = beta - mean * scale
    return scale.astype(jnp.float32), bias.astype(jnp.float32)


def _banded_weight(w_oihw, width, scale, dtype):
    """PyTorch (Cout, Cin, K, K) conv weight -> (K, W*Cin, W*Cout) band.

    Horizontal 'same' padding is folded in: B[kh, wi*Cin+ci, wo*Cout+co] =
    w[co, ci, kh, wi - wo + PAD] when 0 <= wi - wo + PAD < K (and wi in
    [0, W)), else 0.  The per-channel BN scale is folded into the co columns
    in f32 before the dtype cast (exact since the conv has no bias).
    """
    n_co, n_ci, n_kh, n_kw = w_oihw.shape
    wgt = jnp.transpose(w_oihw, (2, 3, 1, 0)).astype(jnp.float32)   # (kh,kw,ci,co)
    wgt = wgt * scale.astype(jnp.float32)[None, None, None, :]      # fold BN scale
    wi = jnp.arange(width)
    wo = jnp.arange(width)
    kw = jnp.arange(n_kw)
    onehot = (wi[None, :, None]
              == wo[None, None, :] + kw[:, None, None] - PAD
              ).astype(jnp.float32)                                 # (kw, wi, wo)
    banded = jnp.einsum('xiw,hxcd->hicwd', onehot, wgt)             # (kh,wi,ci,wo,co)
    return banded.reshape(n_kh, width * n_ci, width * n_co).astype(dtype)


def _double_conv5_impl(x_nchw, params, *, mxu_dtype=jnp.float32):
    """Full DoubleConv5 forward. x: (N, Cin, H, W) -> (N, Cout, H, W)."""
    N, Cin, H, W = x_nchw.shape
    Cmid = params["w1"].shape[0]
    Cout = params["w2"].shape[0]
    Rpad = H + 2 * PAD

    # NCHW -> lane-dense merged (N, H, W*Cin) slab.
    x = jnp.transpose(x_nchw, (0, 2, 3, 1)).astype(jnp.float32).reshape(
        N, H, W * Cin)

    s1, b1 = _fold_bn(params["g1"], params["b1"], params["m1"], params["v1"])
    s2, b2 = _fold_bn(params["g2"], params["b2"], params["m2"], params["v2"])
    w1 = _banded_weight(params["w1"], W, s1, mxu_dtype)     # (K, W*Cin,  W*Cmid)
    w2 = _banded_weight(params["w2"], W, s2, mxu_dtype)     # (K, W*Cmid, W*Cout)
    # Per-channel BN bias tiled over W to line up with the merged layout.
    b1t = jnp.tile(b1, W).reshape(1, W * Cmid)
    b2t = jnp.tile(b2, W).reshape(1, W * Cout)

    out = pl.pallas_call(
        _double_conv5_kernel,
        out_shape=jax.ShapeDtypeStruct((N, H, W * Cout), jnp.float32),
        grid_spec=pltpu.PrefetchScalarGridSpec(
            num_scalar_prefetch=0,
            grid=(1,),                                  # whole batch in one step
            in_specs=[
                pl.BlockSpec((N, H, W * Cin), lambda i: (0, 0, 0)),
                pl.BlockSpec((K, W * Cin, W * Cmid), lambda i: (0, 0, 0)),
                pl.BlockSpec((1, W * Cmid), lambda i: (0, 0)),
                pl.BlockSpec((K, W * Cmid, W * Cout), lambda i: (0, 0, 0)),
                pl.BlockSpec((1, W * Cout), lambda i: (0, 0)),
            ],
            out_specs=pl.BlockSpec((N, H, W * Cout), lambda i: (0, 0, 0)),
            scratch_shapes=[
                pltpu.VMEM((N * Rpad, W * Cin), mxu_dtype),
                pltpu.VMEM((N * Rpad, W * Cmid), mxu_dtype),
            ],
        ),
        compiler_params=pltpu.CompilerParams(
            dimension_semantics=("arbitrary",)),
    )(x, w1, b1t, w2, b2t)

    # (N, H, W*Cout) -> (N, Cout, H, W)
    return jnp.transpose(out.reshape(N, H, W, Cout), (0, 3, 1, 2))


double_conv5 = jax.jit(_double_conv5_impl, static_argnames=("mxu_dtype",))


def _reference(x_nchw, params):
    """Pure-JAX reference (lax.conv) for correctness checking."""
    def stage(x, w, g, b, m, v):
        y = lax.conv_general_dilated(
            x, w, window_strides=(1, 1), padding=((PAD, PAD), (PAD, PAD)),
            dimension_numbers=("NCHW", "OIHW", "NCHW"),
            precision=lax.Precision.HIGHEST)
        scale = (g / jnp.sqrt(v + EPS)).reshape(1, -1, 1, 1)
        bias = (b - m * g / jnp.sqrt(v + EPS)).reshape(1, -1, 1, 1)
        return jnp.maximum(y * scale + bias, 0.0)

    y = stage(x_nchw, params["w1"], params["g1"], params["b1"],
              params["m1"], params["v1"])
    return stage(y, params["w2"], params["g2"], params["b2"],
                 params["m2"], params["v2"])


if __name__ == "__main__":
    N, Cin, Cout, H, W = 2, 4, 8, 16, 16

    key = jax.random.PRNGKey(0)
    keys = jax.random.split(key, 8)

    x = jax.random.normal(keys[0], (N, Cin, H, W), jnp.float32)
    params = {
        "w1": jax.random.normal(keys[1], (Cout, Cin, K, K), jnp.float32) * 0.1,
        "g1": jnp.abs(jax.random.normal(keys[2], (Cout,), jnp.float32)) + 0.5,
        "b1": jax.random.normal(keys[3], (Cout,), jnp.float32) * 0.1,
        "m1": jax.random.normal(keys[4], (Cout,), jnp.float32) * 0.05,
        "v1": jnp.abs(jax.random.normal(keys[5], (Cout,), jnp.float32)) + 0.5,
        "w2": jax.random.normal(keys[6], (Cout, Cout, K, K), jnp.float32) * 0.1,
        "g2": jnp.ones((Cout,), jnp.float32),
        "b2": jnp.zeros((Cout,), jnp.float32),
        "m2": jnp.zeros((Cout,), jnp.float32),
        "v2": jnp.ones((Cout,), jnp.float32),
    }

    ref = jax.block_until_ready(_reference(x, params))

    # f32 path (exact check).
    out = jax.block_until_ready(double_conv5(x, params))
    assert out.shape == (N, Cout, H, W)
    assert jnp.allclose(out, ref, atol=1e-4, rtol=1e-4), (
        float(jnp.max(jnp.abs(out - ref))))

    # bf16 band + bf16 scratch MXU path (all generations), f32 accumulation.
    out_bf16 = jax.block_until_ready(
        double_conv5(x, params, mxu_dtype=jnp.bfloat16))
    assert jnp.allclose(out_bf16, ref, atol=1e-1, rtol=1e-1), (
        float(jnp.max(jnp.abs(out_bf16 - ref))))

    print("KERNEL_OK")
</pallas_src>

<mosaic_0001>
module attributes {stable_mosaic.version = 11 : i64} {
  func.func @_double_conv5_kernel(%arg0: i32, %arg1: memref<2x16x64xf32, #tpu.memory_space<vmem>>, %arg2: memref<5x64x128xf32, #tpu.memory_space<vmem>>, %arg3: memref<1x128xf32, #tpu.memory_space<vmem>>, %arg4: memref<5x128x128xf32, #tpu.memory_space<vmem>>, %arg5: memref<1x128xf32, #tpu.memory_space<vmem>>, %arg6: memref<2x16x128xf32, #tpu.memory_space<vmem>>, %arg7: memref<40x64xf32, #tpu.memory_space<vmem>>, %arg8: memref<40x128xf32, #tpu.memory_space<vmem>>) attributes {dimension_semantics = [#tpu.dimension_semantics<arbitrary>], iteration_bounds = array<i64: 1>, scalar_prefetch = 0 : i64, scratch_operands = 2 : i64, tpu.core_type = #tpu.core_type<tc>, window_params = [{pipeline_mode = #tpu.pipeline_mode<synchronous>, transform_indices = @transform_0, window_bounds = array<i64: 2, 16, 64>}, {pipeline_mode = #tpu.pipeline_mode<synchronous>, transform_indices = @transform_1, window_bounds = array<i64: 5, 64, 128>}, {pipeline_mode = #tpu.pipeline_mode<synchronous>, transform_indices = @transform_2, window_bounds = array<i64: 1, 128>}, {pipeline_mode = #tpu.pipeline_mode<synchronous>, transform_indices = @transform_3, window_bounds = array<i64: 5, 128, 128>}, {pipeline_mode = #tpu.pipeline_mode<synchronous>, transform_indices = @transform_4, window_bounds = array<i64: 1, 128>}, {pipeline_mode = #tpu.pipeline_mode<synchronous>, transform_indices = @transform_5, window_bounds = array<i64: 2, 16, 128>}]} {
    %cst = arith.constant 0.000000e+00 : f32
    %0 = vector.broadcast %cst : f32 to vector<2x64xf32>
    %cst_0 = arith.constant 0.000000e+00 : f32
    %1 = vector.broadcast %cst_0 : f32 to vector<2x128xf32>
    %c0 = arith.constant 0 : index
    %c0_1 = arith.constant 0 : index
    %2 = vector.load %arg7[%c0, %c0_1] : memref<40x64xf32, #tpu.memory_space<vmem>>, vector<2x64xf32>
    tpu.vector_store %arg7[%c0, %c0_1], %0 {strides = array<i32>} : memref<40x64xf32, #tpu.memory_space<vmem>>, vector<2x64xf32>,
    %c18 = arith.constant 18 : index
    %c0_2 = arith.constant 0 : index
    %3 = vector.load %arg7[%c18, %c0_2] : memref<40x64xf32, #tpu.memory_space<vmem>>, vector<2x64xf32>
    tpu.vector_store %arg7[%c18, %c0_2], %0 {strides = array<i32>} : memref<40x64xf32, #tpu.memory_space<vmem>>, vector<2x64xf32>,
    %c0_3 = arith.constant 0 : index
    %c0_4 = arith.constant 0 : index
    %4 = vector.load %arg8[%c0_3, %c0_4] : memref<40x128xf32, #tpu.memory_space<vmem>>, vector<2x128xf32>
    tpu.vector_store %arg8[%c0_3, %c0_4], %1 {strides = array<i32>} : memref<40x128xf32, #tpu.memory_space<vmem>>, vector<2x128xf32>,
    %c18_5 = arith.constant 18 : index
    %c0_6 = arith.constant 0 : index
    %5 = vector.load %arg8[%c18_5, %c0_6] : memref<40x128xf32, #tpu.memory_space<vmem>>, vector<2x128xf32>
    tpu.vector_store %arg8[%c18_5, %c0_6], %1 {strides = array<i32>} : memref<40x128xf32, #tpu.memory_space<vmem>>, vector<2x128xf32>,
    %c20 = arith.constant 20 : index
    %c0_7 = arith.constant 0 : index
    %6 = vector.load %arg7[%c20, %c0_7] : memref<40x64xf32, #tpu.memory_space<vmem>>, vector<2x64xf32>
    tpu.vector_store %arg7[%c20, %c0_7], %0 {strides = array<i32>} : memref<40x64xf32, #tpu.memory_space<vmem>>, vector<2x64xf32>,
    %c38 = arith.constant 38 : index
    %c0_8 = arith.constant 0 : index
    %7 = vector.load %arg7[%c38, %c0_8] : memref<40x64xf32, #tpu.memory_space<vmem>>, vector<2x64xf32>
    tpu.vector_store %arg7[%c38, %c0_8], %0 {strides = array<i32>} : memref<40x64xf32, #tpu.memory_space<vmem>>, vector<2x64xf32>,
    %c20_9 = arith.constant 20 : index
    %c0_10 = arith.constant 0 : index
    %8 = vector.load %arg8[%c20_9, %c0_10] : memref<40x128xf32, #tpu.memory_space<vmem>>, vector<2x128xf32>
    tpu.vector_store %arg8[%c20_9, %c0_10], %1 {strides = array<i32>} : memref<40x128xf32, #tpu.memory_space<vmem>>, vector<2x128xf32>,
    %c38_11 = arith.constant 38 : index
    %c0_12 = arith.constant 0 : index
    %9 = vector.load %arg8[%c38_11, %c0_12] : memref<40x128xf32, #tpu.memory_space<vmem>>, vector<2x128xf32>
    tpu.vector_store %arg8[%c38_11, %c0_12], %1 {strides = array<i32>} : memref<40x128xf32, #tpu.memory_space<vmem>>, vector<2x128xf32>,
    %c0_13 = arith.constant 0 : index
    %c0_14 = arith.constant 0 : index
    %c0_15 = arith.constant 0 : index
    %10 = vector.load %arg1[%c0_13, %c0_14, %c0_15] : memref<2x16x64xf32, #tpu.memory_space<vmem>>, vector<1x16x64xf32>
    %11 = vector.shape_cast %10 : vector<1x16x64xf32> to vector<16x64xf32>
    %c2 = arith.constant 2 : index
    %c0_16 = arith.constant 0 : index
    %12 = vector.load %arg7[%c2, %c0_16] : memref<40x64xf32, #tpu.memory_space<vmem>>, vector<16x64xf32>
    tpu.vector_store %arg7[%c2, %c0_16], %11 {strides = array<i32>} : memref<40x64xf32, #tpu.memory_space<vmem>>, vector<16x64xf32>,
    %c1 = arith.constant 1 : index
    %c0_17 = arith.constant 0 : index
    %c0_18 = arith.constant 0 : index
    %13 = vector.load %arg1[%c1, %c0_17, %c0_18] : memref<2x16x64xf32, #tpu.memory_space<vmem>>, vector<1x16x64xf32>
    %14 = vector.shape_cast %13 : vector<1x16x64xf32> to vector<16x64xf32>
    %c22 = arith.constant 22 : index
    %c0_19 = arith.constant 0 : index
    %15 = vector.load %arg7[%c22, %c0_19] : memref<40x64xf32, #tpu.memory_space<vmem>>, vector<16x64xf32>
    tpu.vector_store %arg7[%c22, %c0_19], %14 {strides = array<i32>} : memref<40x64xf32, #tpu.memory_space<vmem>>, vector<16x64xf32>,
    %cst_20 = arith.constant 0.000000e+00 : f32
    %16 = vector.broadcast %cst_20 : f32 to vector<36x128xf32>
    %c0_21 = arith.constant 0 : index
    %c0_22 = arith.constant 0 : index
    %17 = vector.load %arg7[%c0_21, %c0_22] : memref<40x64xf32, #tpu.memory_space<vmem>>, vector<36x64xf32>
    %c0_23 = arith.constant 0 : index
    %c0_24 = arith.constant 0 : index
    %c0_25 = arith.constant 0 : index
    %18 = vector.load %arg2[%c0_23, %c0_24, %c0_25] : memref<5x64x128xf32, #tpu.memory_space<vmem>>, vector<1x64x128xf32>
    %19 = vector.shape_cast %18 : vector<1x64x128xf32> to vector<64x128xf32>
    %cst_26 = arith.constant dense<0.000000e+00> : vector<36x128xf32>
    %20 = tpu.matmul %17, %19, %cst_26 {dimension_numbers = #tpu.dot_dimension_numbers<[1], [0], [0], [1], [0, 0, 1, 1], [], []>} : vector<36x64xf32>, vector<64x128xf32>, vector<36x128xf32> -> vector<36x128xf32>
    %21 = arith.addf %16, %20 : vector<36x128xf32>
    %c1_27 = arith.constant 1 : index
    %c0_28 = arith.constant 0 : index
    %22 = vector.load %arg7[%c1_27, %c0_28] : memref<40x64xf32, #tpu.memory_space<vmem>>, vector<36x64xf32>
    %c1_29 = arith.constant 1 : index
    %c0_30 = arith.constant 0 : index
    %c0_31 = arith.constant 0 : index
    %23 = vector.load %arg2[%c1_29, %c0_30, %c0_31] : memref<5x64x128xf32, #tpu.memory_space<vmem>>, vector<1x64x128xf32>
    %24 = vector.shape_cast %23 : vector<1x64x128xf32> to vector<64x128xf32>
    %cst_32 = arith.constant dense<0.000000e+00> : vector<36x128xf32>
    %25 = tpu.matmul %22, %24, %cst_32 {dimension_numbers = #tpu.dot_dimension_numbers<[1], [0], [0], [1], [0, 0, 1, 1], [], []>} : vector<36x64xf32>, vector<64x128xf32>, vector<36x128xf32> -> vector<36x128xf32>
    %26 = arith.addf %21, %25 : vector<36x128xf32>
    %c2_33 = arith.constant 2 : index
    %c0_34 = arith.constant 0 : index
    %27 = vector.load %arg7[%c2_33, %c0_34] : memref<40x64xf32, #tpu.memory_space<vmem>>, vector<36x64xf32>
    %c2_35 = arith.constant 2 : index
    %c0_36 = arith.constant 0 : index
    %c0_37 = arith.constant 0 : index
    %28 = vector.load %arg2[%c2_35, %c0_36, %c0_37] : memref<5x64x128xf32, #tpu.memory_space<vmem>>, vector<1x64x128xf32>
    %29 = vector.shape_cast %28 : vector<1x64x128xf32> to vector<64x128xf32>
    %cst_38 = arith.constant dense<0.000000e+00> : vector<36x128xf32>
    %30 = tpu.matmul %27, %29, %cst_38 {dimension_numbers = #tpu.dot_dimension_numbers<[1], [0], [0], [1], [0, 0, 1, 1], [], []>} : vector<36x64xf32>, vector<64x128xf32>, vector<36x128xf32> -> vector<36x128xf32>
    %31 = arith.addf %26, %30 : vector<36x128xf32>
    %c3 = arith.constant 3 : index
    %c0_39 = arith.constant 0 : index
    %32 = vector.load %arg7[%c3, %c0_39] : memref<40x64xf32, #tpu.memory_space<vmem>>, vector<36x64xf32>
    %c3_40 = arith.constant 3 : index
    %c0_41 = arith.constant 0 : index
    %c0_42 = arith.constant 0 : index
    %33 = vector.load %arg2[%c3_40, %c0_41, %c0_42] : memref<5x64x128xf32, #tpu.memory_space<vmem>>, vector<1x64x128xf32>
    %34 = vector.shape_cast %33 : vector<1x64x128xf32> to vector<64x128xf32>
    %cst_43 = arith.constant dense<0.000000e+00> : vector<36x128xf32>
    %35 = tpu.matmul %32, %34, %cst_43 {dimension_numbers = #tpu.dot_dimension_numbers<[1], [0], [0], [1], [0, 0, 1, 1], [], []>} : vector<36x64xf32>, vector<64x128xf32>, vector<36x128xf32> -> vector<36x128xf32>
    %36 = arith.addf %31, %35 : vector<36x128xf32>
    %c4 = arith.constant 4 : index
    %c0_44 = arith.constant 0 : index
    %37 = vector.load %arg7[%c4, %c0_44] : memref<40x64xf32, #tpu.memory_space<vmem>>, vector<36x64xf32>
    %c4_45 = arith.constant 4 : index
    %c0_46 = arith.constant 0 : index
    %c0_47 = arith.constant 0 : index
    %38 = vector.load %arg2[%c4_45, %c0_46, %c0_47] : memref<5x64x128xf32, #tpu.memory_space<vmem>>, vector<1x64x128xf32>
    %39 = vector.shape_cast %38 : vector<1x64x128xf32> to vector<64x128xf32>
    %cst_48 = arith.constant dense<0.000000e+00> : vector<36x128xf32>
    %40 = tpu.matmul %37, %39, %cst_48 {dimension_numbers = #tpu.dot_dimension_numbers<[1], [0], [0], [1], [0, 0, 1, 1], [], []>} : vector<36x64xf32>, vector<64x128xf32>, vector<36x128xf32> -> vector<36x128xf32>
    %41 = arith.addf %36, %40 : vector<36x128xf32>
    %c0_49 = arith.constant 0 : index
    %c0_50 = arith.constant 0 : index
    %42 = vector.load %arg3[%c0_49, %c0_50] : memref<1x128xf32, #tpu.memory_space<vmem>>, vector<1x128xf32>
    %43 = vector.broadcast %42 : vector<1x128xf32> to vector<36x128xf32>
    %44 = arith.addf %41, %43 : vector<36x128xf32>
    %cst_51 = arith.constant 0.000000e+00 : f32
    %45 = vector.broadcast %cst_51 : f32 to vector<36x128xf32>
    %46 = arith.maximumf %44, %45 : vector<36x128xf32>
    %47 = vector.extract_strided_slice %46 {offsets = [0, 0], sizes = [16, 128], strides = [1, 1]} : vector<36x128xf32> to vector<16x128xf32>
    %c2_52 = arith.constant 2 : index
    %c0_53 = arith.constant 0 : index
    %48 = vector.load %arg8[%c2_52, %c0_53] : memref<40x128xf32, #tpu.memory_space<vmem>>, vector<16x128xf32>
    tpu.vector_store %arg8[%c2_52, %c0_53], %47 {strides = array<i32>} : memref<40x128xf32, #tpu.memory_space<vmem>>, vector<16x128xf32>,
    %49 = vector.extract_strided_slice %46 {offsets = [20, 0], sizes = [16, 128], strides = [1, 1]} : vector<36x128xf32> to vector<16x128xf32>
    %c22_54 = arith.constant 22 : index
    %c0_55 = arith.constant 0 : index
    %50 = vector.load %arg8[%c22_54, %c0_55] : memref<40x128xf32, #tpu.memory_space<vmem>>, vector<16x128xf32>
    tpu.vector_store %arg8[%c22_54, %c0_55], %49 {strides = array<i32>} : memref<40x128xf32, #tpu.memory_space<vmem>>, vector<16x128xf32>,
    %cst_56 = arith.constant 0.000000e+00 : f32
    %51 = vector.broadcast %cst_56 : f32 to vector<36x128xf32>
    %c0_57 = arith.constant 0 : index
    %c0_58 = arith.constant 0 : index
    %52 = vector.load %arg8[%c0_57, %c0_58] : memref<40x128xf32, #tpu.memory_space<vmem>>, vector<36x128xf32>
    %c0_59 = arith.constant 0 : index
    %c0_60 = arith.constant 0 : index
    %c0_61 = arith.constant 0 : index
    %53 = vector.load %arg4[%c0_59, %c0_60, %c0_61] : memref<5x128x128xf32, #tpu.memory_space<vmem>>, vector<1x128x128xf32>
    %54 = vector.shape_cast %53 : vector<1x128x128xf32> to vector<128x128xf32>
    %cst_62 = arith.constant dense<0.000000e+00> : vector<36x128xf32>
    %55 = tpu.matmul %52, %54, %cst_62 {dimension_numbers = #tpu.dot_dimension_numbers<[1], [0], [0], [1], [0, 0, 1, 1], [], []>} : vector<36x128xf32>, vector<128x128xf32>, vector<36x128xf32> -> vector<36x128xf32>
    %56 = arith.addf %51, %55 : vector<36x128xf32>
    %c1_63 = arith.constant 1 : index
    %c0_64 = arith.constant 0 : index
    %57 = vector.load %arg8[%c1_63, %c0_64] : memref<40x128xf32, #tpu.memory_space<vmem>>, vector<36x128xf32>
    %c1_65 = arith.constant 1 : index
    %c0_66 = arith.constant 0 : index
    %c0_67 = arith.constant 0 : index
    %58 = vector.load %arg4[%c1_65, %c0_66, %c0_67] : memref<5x128x128xf32, #tpu.memory_space<vmem>>, vector<1x128x128xf32>
    %59 = vector.shape_cast %58 : vector<1x128x128xf32> to vector<128x128xf32>
    %cst_68 = arith.constant dense<0.000000e+00> : vector<36x128xf32>
    %60 = tpu.matmul %57, %59, %cst_68 {dimension_numbers = #tpu.dot_dimension_numbers<[1], [0], [0], [1], [0, 0, 1, 1], [], []>} : vector<36x128xf32>, vector<128x128xf32>, vector<36x128xf32> -> vector<36x128xf32>
    %61 = arith.addf %56, %60 : vector<36x128xf32>
    %c2_69 = arith.constant 2 : index
    %c0_70 = arith.constant 0 : index
    %62 = vector.load %arg8[%c2_69, %c0_70] : memref<40x128xf32, #tpu.memory_space<vmem>>, vector<36x128xf32>
    %c2_71 = arith.constant 2 : index
    %c0_72 = arith.constant 0 : index
    %c0_73 = arith.constant 0 : index
    %63 = vector.load %arg4[%c2_71, %c0_72, %c0_73] : memref<5x128x128xf32, #tpu.memory_space<vmem>>, vector<1x128x128xf32>
    %64 = vector.shape_cast %63 : vector<1x128x128xf32> to vector<128x128xf32>
    %cst_74 = arith.constant dense<0.000000e+00> : vector<36x128xf32>
    %65 = tpu.matmul %62, %64, %cst_74 {dimension_numbers = #tpu.dot_dimension_numbers<[1], [0], [0], [1], [0, 0, 1, 1], [], []>} : vector<36x128xf32>, vector<128x128xf32>, vector<36x128xf32> -> vector<36x128xf32>
    %66 = arith.addf %61, %65 : vector<36x128xf32>
    %c3_75 = arith.constant 3 : index
    %c0_76 = arith.constant 0 : index
    %67 = vector.load %arg8[%c3_75, %c0_76] : memref<40x128xf32, #tpu.memory_space<vmem>>, vector<36x128xf32>
    %c3_77 = arith.constant 3 : index
    %c0_78 = arith.constant 0 : index
    %c0_79 = arith.constant 0 : index
    %68 = vector.load %arg4[%c3_77, %c0_78, %c0_79] : memref<5x128x128xf32, #tpu.memory_space<vmem>>, vector<1x128x128xf32>
    %69 = vector.shape_cast %68 : vector<1x128x128xf32> to vector<128x128xf32>
    %cst_80 = arith.constant dense<0.000000e+00> : vector<36x128xf32>
    %70 = tpu.matmul %67, %69, %cst_80 {dimension_numbers = #tpu.dot_dimension_numbers<[1], [0], [0], [1], [0, 0, 1, 1], [], []>} : vector<36x128xf32>, vector<128x128xf32>, vector<36x128xf32> -> vector<36x128xf32>
    %71 = arith.addf %66, %70 : vector<36x128xf32>
    %c4_81 = arith.constant 4 : index
    %c0_82 = arith.constant 0 : index
    %72 = vector.load %arg8[%c4_81, %c0_82] : memref<40x128xf32, #tpu.memory_space<vmem>>, vector<36x128xf32>
    %c4_83 = arith.constant 4 : index
    %c0_84 = arith.constant 0 : index
    %c0_85 = arith.constant 0 : index
    %73 = vector.load %arg4[%c4_83, %c0_84, %c0_85] : memref<5x128x128xf32, #tpu.memory_space<vmem>>, vector<1x128x128xf32>
    %74 = vector.shape_cast %73 : vector<1x128x128xf32> to vector<128x128xf32>
    %cst_86 = arith.constant dense<0.000000e+00> : vector<36x128xf32>
    %75 = tpu.matmul %72, %74, %cst_86 {dimension_numbers = #tpu.dot_dimension_numbers<[1], [0], [0], [1], [0, 0, 1, 1], [], []>} : vector<36x128xf32>, vector<128x128xf32>, vector<36x128xf32> -> vector<36x128xf32>
    %76 = arith.addf %71, %75 : vector<36x128xf32>
    %c0_87 = arith.constant 0 : index
    %c0_88 = arith.constant 0 : index
    %77 = vector.load %arg5[%c0_87, %c0_88] : memref<1x128xf32, #tpu.memory_space<vmem>>, vector<1x128xf32>
    %78 = vector.broadcast %77 : vector<1x128xf32> to vector<36x128xf32>
    %79 = arith.addf %76, %78 : vector<36x128xf32>
    %cst_89 = arith.constant 0.000000e+00 : f32
    %80 = vector.broadcast %cst_89 : f32 to vector<36x128xf32>
    %81 = arith.maximumf %79, %80 : vector<36x128xf32>
    %82 = vector.extract_strided_slice %81 {offsets = [0, 0], sizes = [16, 128], strides = [1, 1]} : vector<36x128xf32> to vector<16x128xf32>
    %c0_90 = arith.constant 0 : index
    %c0_91 = arith.constant 0 : index
    %c0_92 = arith.constant 0 : index
    %83 = vector.load %arg6[%c0_90, %c0_91, %c0_92] : memref<2x16x128xf32, #tpu.memory_space<vmem>>, vector<1x16x128xf32>
    %84 = vector.shape_cast %83 : vector<1x16x128xf32> to vector<16x128xf32>
    %85 = vector.shape_cast %82 : vector<16x128xf32> to vector<1x16x128xf32>
    tpu.vector_store %arg6[%c0_90, %c0_91, %c0_92], %85 {strides = array<i32>} : memref<2x16x128xf32, #tpu.memory_space<vmem>>, vector<1x16x128xf32>,
    %86 = vector.extract_strided_slice %81 {offsets = [20, 0], sizes = [16, 128], strides = [1, 1]} : vector<36x128xf32> to vector<16x128xf32>
    %c1_93 = arith.constant 1 : index
    %c0_94 = arith.constant 0 : index
    %c0_95 = arith.constant 0 : index
    %87 = vector.load %arg6[%c1_93, %c0_94, %c0_95] : memref<2x16x128xf32, #tpu.memory_space<vmem>>, vector<1x16x128xf32>
    %88 = vector.shape_cast %87 : vector<1x16x128xf32> to vector<16x128xf32>
    %89 = vector.shape_cast %86 : vector<16x128xf32> to vector<1x16x128xf32>
    tpu.vector_store %arg6[%c1_93, %c0_94, %c0_95], %89 {strides = array<i32>} : memref<2x16x128xf32, #tpu.memory_space<vmem>>, vector<1x16x128xf32>,
    return
  }
  func.func @transform_0(%arg0: i32) -> (i32, i32, i32) {
    %c0_i32 = arith.constant 0 : i32
    %c0_i32_0 = arith.constant 0 : i32
    %c0_i32_1 = arith.constant 0 : i32
    %c0_i32_2 = arith.constant 0 : i32
    return %c0_i32, %c0_i32_0, %c0_i32_1 : i32, i32, i32
  }
  func.func @transform_1(%arg0: i32) -> (i32, i32, i32) {
    %c0_i32 = arith.constant 0 : i32
    %c0_i32_0 = arith.constant 0 : i32
    %c0_i32_1 = arith.constant 0 : i32
    %c0_i32_2 = arith.constant 0 : i32
    return %c0_i32, %c0_i32_0, %c0_i32_1 : i32, i32, i32
  }
  func.func @transform_2(%arg0: i32) -> (i32, i32) {
    %c0_i32 = arith.constant 0 : i32
    %c0_i32_0 = arith.constant 0 : i32
    %c0_i32_1 = arith.constant 0 : i32
    return %c0_i32, %c0_i32_0 : i32, i32
  }
  func.func @transform_3(%arg0: i32) -> (i32, i32, i32) {
    %c0_i32 = arith.constant 0 : i32
    %c0_i32_0 = arith.constant 0 : i32
    %c0_i32_1 = arith.constant 0 : i32
    %c0_i32_2 = arith.constant 0 : i32
    return %c0_i32, %c0_i32_0, %c0_i32_1 : i32, i32, i32
  }
  func.func @transform_4(%arg0: i32) -> (i32, i32) {
    %c0_i32 = arith.constant 0 : i32
    %c0_i32_0 = arith.constant 0 : i32
    %c0_i32_1 = arith.constant 0 : i32
    return %c0_i32, %c0_i32_0 : i32, i32
  }
  func.func @transform_5(%arg0: i32) -> (i32, i32, i32) {
    %c0_i32 = arith.constant 0 : i32
    %c0_i32_0 = arith.constant 0 : i32
    %c0_i32_1 = arith.constant 0 : i32
    %c0_i32_2 = arith.constant 0 : i32
    return %c0_i32, %c0_i32_0, %c0_i32_1 : i32, i32, i32
  }
}

</mosaic_0001>

<bundles_post_ra>
// kernel: tile.13
= control target key start
LH: loop header
LB: loop body
LE: loop exit
PB: predicated region body
PF: predicated region fallthrough
CT: control target
= control target key end

     0   :  { %s28_s0 = inlined_call_operand.vmem [shape: f32[8], index: 0, kind: input, shape index: {}]   ;;  %s29_s1 = inlined_call_operand.vmem [shape: f32[16,8], index: 1, kind: output, shape index: {}]  }
   0x1   :  { %v4_v0 = vld [vmem:[%s28_s0] ss:$0 sm:$0xff] }
   0x2   :  { %5 = vst [vmem:[%s29_s1] sm:$0xff] %v4_v0  ;;  %8 = vst [vmem:[%s29_s1 + $0x8] sm:$0xff] %v4_v0 }

// kernel: tile.14
= control target key start
LH: loop header
LB: loop body
LE: loop exit
PB: predicated region body
PF: predicated region fallthrough
CT: control target
= control target key end

     0   :  { %s133_s10 = smov 120   ;;  %s134_s11 = smov 104   ;;  %vm3_vm0 = vcmask 64512   ;;  %vm9_vm1 = vcmask 1048512   ;;  %vm15_vm2 = vcmask 982912   ;;  %vm21_vm3 = vcmask 917312   ;;  %s209_s0 = inlined_call_operand.vmem [shape: f32[16,8], index: 0, kind: input, shape index: {}]   ;;  %s210_s1 = inlined_call_operand.vmem [shape: f32[1,128], index: 1, kind: output, shape index: {}]  }
   0x1   :  { %v103_v0 = vld [vmem:[%s209_s0 + $0xf] sm:$0x1]   ;;  %v105_v1 = vld [vmem:[%s209_s0 + $0xd] sm:$0x1]   ;;  %v104_v2 = vld [vmem:[%s209_s0 + $0xe] sm:$0x1]  }
   0x2   :  { %7 = vrot.lane.b32.xlu0 %v103_v0, %s133_s10  ;;  %19 = vrot.lane.b32.xlu1 %v105_v1, %s134_s11  ;;  %v106_v3 = vld [vmem:[%s209_s0 + $0xc] sm:$0x1]   ;;  %s135_s16 = smov 112   ;;  %s136_s17 = smov 96   ;;  %v107_v4 = vld [vmem:[%s209_s0 + $0xb] sm:$0x1]  }
   0x3   :  { %v108_v5 = vld [vmem:[%s209_s0 + $0xa] sm:$0x1]   ;;  %v2_v6 = vld [vmem:[%s209_s0] sm:$0x1]   ;;  %s137_s24 = smov 88   ;;  %s138_s25 = smov 80  }
   0x4   :  { %4 = vst.msk [vmem:[#allocation0] sm:$0x1] %vm3_vm0, %v2_v6   ;;  %v109_v7 = vld [vmem:[%s209_s0 + $0x9] sm:$0x1]   ;;  %v110_v8 = vld [vmem:[%s209_s0 + $0x8] sm:$0x1]  }
   0x5   :  { %s139_s30 = smov 72   ;;  %s140_s2 = smov 64   ;;  %v111_v9 = vld [vmem:[%s209_s0 + $0x7] sm:$0x1]   ;;  %v112_v10 = vld [vmem:[%s209_s0 + $0x6] sm:$0x1]  }
   0x6   :  { %13 = vrot.lane.b32.xlu0 %v104_v2, %s135_s16  ;;  %25 = vrot.lane.b32.xlu1 %v106_v3, %s136_s17  ;;  %s141_s7 = smov 56   ;;  %s142_s8 = smov 48   ;;  %v113_v11 = vld [vmem:[%s209_s0 + $0x5] sm:$0x1]   ;;  %v114_v12 = vld [vmem:[%s209_s0 + $0x4] sm:$0x1]  }
   0x7   :  { %s143_s13 = smov 40   ;;  %s144_s14 = smov 32   ;;  %v115_v13 = vld [vmem:[%s209_s0 + $0x3] sm:$0x1]   ;;  %v116_v14 = vld [vmem:[%s209_s0 + $0x2] sm:$0x1]  }
   0x8   :  { %s145_s19 = smov 24   ;;  %s146_s20 = smov 16   ;;  %v117_v15 = vld [vmem:[%s209_s0 + $0x1] sm:$0x1]   ;;  %vm27_vm4 = vcmask 851712   ;;  %vm33_vm5 = vcmask 786112  }
   0x9   :  { %s147_s0 = smov 8   ;;  %vm39_vm6 = vcmask 720512   ;;  %vm45_vm7 = vcmask 654912   ;;  %vm51_vm8 = vcmask 589312   ;;  %vm57_vm9 = vcmask 523712  }
   0xa   :  { %31 = vrot.lane.b32.xlu0 %v107_v4, %s137_s24  ;;  %37 = vrot.lane.b32.xlu1 %v108_v5, %s138_s25  ;;  %vm63_vm10 = vcmask 458112   ;;  %vm69_vm11 = vcmask 392512   ;;  %vm75_vm12 = vcmask 326912   ;;  %vm81_vm13 = vcmask 261312  }
   0xb   :  { %vm87_vm14 = vcmask 195712   ;;  %vm93_vm15 = vcmask 130112  }
   0xe   :  { %43 = vrot.lane.b32.xlu0 %v109_v7, %s139_s30  ;;  %49 = vrot.lane.b32.xlu1 %v110_v8, %s140_s2 }
  0x12   :  { %55 = vrot.lane.b32.xlu0 %v111_v9, %s141_s7  ;;  %61 = vrot.lane.b32.xlu1 %v112_v10, %s142_s8 }
  0x16   :  { %67 = vrot.lane.b32.xlu0 %v113_v11, %s143_s13  ;;  %73 = vrot.lane.b32.xlu1 %v114_v12, %s144_s14 }
  0x1a   :  { %79 = vrot.lane.b32.xlu0 %v115_v13, %s145_s19  ;;  %85 = vrot.lane.b32.xlu1 %v116_v14, %s146_s20 }
  0x1e   :  { %91 = vrot.lane.b32.xlu0 %v117_v15, %s147_s0 }
  0x74   :  { %v8_v16 = vpop.permute.xlu0 %7   ;;  %v20_v17 = vpop.permute.xlu1 %19  }
  0x75   :  { %10 = vst.msk [vmem:[#allocation0] sm:$0x1] %vm9_vm1, %v8_v16  }
  0x78   :  { %v14_v18 = vpop.permute.xlu0 %13   ;;  %v26_v19 = vpop.permute.xlu1 %25  }
  0x79   :  { %16 = vst.msk [vmem:[#allocation0] sm:$0x1] %vm15_vm2, %v14_v18  }
  0x7a   :  { %22 = vst.msk [vmem:[#allocation0] sm:$0x1] %vm21_vm3, %v20_v17  }
  0x7b   :  { %28 = vst.msk [vmem:[#allocation0] sm:$0x1] %vm27_vm4, %v26_v19  }
  0x7c   :  { %v32_v20 = vpop.permute.xlu0 %31   ;;  %v38_v21 = vpop.permute.xlu1 %37  }
  0x7d   :  { %34 = vst.msk [vmem:[#allocation0] sm:$0x1] %vm33_vm5, %v32_v20  }
  0x7e   :  { %40 = vst.msk [vmem:[#allocation0] sm:$0x1] %vm39_vm6, %v38_v21  }
  0x80   :  { %v44_v22 = vpop.permute.xlu0 %43   ;;  %v50_v23 = vpop.permute.xlu1 %49  }
  0x81   :  { %46 = vst.msk [vmem:[#allocation0] sm:$0x1] %vm45_vm7, %v44_v22  }
  0x82   :  { %52 = vst.msk [vmem:[#allocation0] sm:$0x1] %vm51_vm8, %v50_v23  }
  0x84   :  { %v56_v24 = vpop.permute.xlu0 %55   ;;  %v62_v25 = vpop.permute.xlu1 %61  }
  0x85   :  { %58 = vst.msk [vmem:[#allocation0] sm:$0x1] %vm57_vm9, %v56_v24  }
  0x86   :  { %64 = vst.msk [vmem:[#allocation0] sm:$0x1] %vm63_vm10, %v62_v25  }
  0x88   :  { %v68_v26 = vpop.permute.xlu0 %67   ;;  %v74_v27 = vpop.permute.xlu1 %73  }
  0x89   :  { %70 = vst.msk [vmem:[#allocation0] sm:$0x1] %vm69_vm11, %v68_v26  }
  0x8a   :  { %76 = vst.msk [vmem:[#allocation0] sm:$0x1] %vm75_vm12, %v74_v27  }
  0x8c   :  { %v80_v28 = vpop.permute.xlu0 %79   ;;  %v86_v29 = vpop.permute.xlu1 %85  }
  0x8d   :  { %82 = vst.msk [vmem:[#allocation0] sm:$0x1] %vm81_vm13, %v80_v28  }
  0x8e   :  { %88 = vst.msk [vmem:[#allocation0] sm:$0x1] %vm87_vm14, %v86_v29  }
  0x90   :  { %v92_v30 = vpop.permute.xlu0 %91  }
  0x91   :  { %94 = vst.msk [vmem:[#allocation0] sm:$0x1] %vm93_vm15, %v92_v30  }
  0x98   :  { %v99_v31 = vld [vmem:[#allocation0] sm:$0x1] }
  0x99   :  { %102 = vst [vmem:[%s210_s1] sm:$0x1] %v99_v31 }

// kernel: _double_conv5_impl.1
= control target key start
LH: loop header
LB: loop body
LE: loop exit
PB: predicated region body
PF: predicated region fallthrough
CT: control target
= control target key end

     0   :  { %vm20_vm0 = vcmask 517120   ;;  %v1961_v0 = vmov 0.0   ;;  %vm31_vm1 = vcmask 523264   ;;  %vm1962_vm2 = vmmov 0   ;;  %s2664_s1 = inlined_call_operand.vmem [shape: f32[5,64,128], index: 1, kind: input, shape index: {}]   ;;  %s2665_s0 = inlined_call_operand.vmem [shape: f32[2,16,64], index: 0, kind: input, shape index: {}]   ;;  %s2666_s3 = inlined_call_operand.vmem [shape: f32[5,128,128], index: 3, kind: input, shape index: {}]   ;;  %s2667_s2 = inlined_call_operand.vmem [shape: f32[1,128], index: 2, kind: input, shape index: {}]   ;;  %s2668_s4 = inlined_call_operand.vmem [shape: f32[1,128], index: 4, kind: input, shape index: {}]   ;;  %s2669_s5 = inlined_call_operand.vmem [shape: f32[2,16,128], index: 5, kind: output, shape index: {}]  }
   0x1   :  { %1569 = vmatprep.subr.mxu0 %v1961_v0  ;;  %23 = vst [vmem:[#allocation3] sm:$0x3] %v1961_v0  ;;  %24 = vst [vmem:[#allocation3 + $0x12] sm:$0x3] %v1961_v0  ;;  %v1280_v1 = vld [vmem:[%s2664_s1 + $0x78] sm:$0xff]  ;;  %1600 = vmatprep.subr.mxu1 %v1961_v0  ;;  %v1279_v3 = vld [vmem:[%s2664_s1 + $0x70] sm:$0xff] }
   0x2   :  { %27 = vst [vmem:[#allocation3 + $0x14] sm:$0x3] %v1961_v0  ;;  %28 = vst [vmem:[#allocation3 + $0x26] sm:$0x3] %v1961_v0  ;;  %v51_v2 = vld [vmem:[%s2664_s1 + $0x38] sm:$0xff]  ;;  %1570 = vmatpush3.msra.mxu0 %v1280_v1  ;;  %v50_v4 = vld [vmem:[%s2664_s1 + $0x30] sm:$0xff]  ;;  %1585 = vmatprep.mubr.msk.f32.mxu0 %vm1962_vm2, %v1961_v0 }
   0x3   :  { %21 = vst.msk [vmem:[#allocation2] sm:$0x3] %vm20_vm0, %v1961_v0  ;;  %22 = vst.msk [vmem:[#allocation2 + $0x12] sm:$0x3] %vm20_vm0, %v1961_v0  ;;  %1601 = vmatpush3.msra.mxu1 %v51_v2  ;;  %1571 = vmatprep.subr.mxu0 %v1961_v0  ;;  %v1278_v5 = vld [vmem:[%s2664_s1 + $0x68] sm:$0xff]  ;;  %v1277_v7 = vld [vmem:[%s2664_s1 + $0x60] sm:$0xff] }
   0x4   :  { %25 = vst.msk [vmem:[#allocation2 + $0x14] sm:$0x3] %vm20_vm0, %v1961_v0  ;;  %26 = vst.msk [vmem:[#allocation2 + $0x26] sm:$0x3] %vm20_vm0, %v1961_v0  ;;  %1602 = vmatprep.subr.mxu1 %v1961_v0  ;;  %v49_v6 = vld [vmem:[%s2664_s1 + $0x28] sm:$0xff]  ;;  %1572 = vmatpush3.msra.mxu0 %v1279_v3  ;;  %v48_v8 = vld [vmem:[%s2664_s1 + $0x20] sm:$0xff] }
   0x5   :  { %1603 = vmatpush3.msra.mxu1 %v50_v4  ;;  %1573 = vmatprep.subr.mxu0 %v1961_v0  ;;  %v29_v9 = vld [vmem:[%s2665_s0] sm:$0xff]  ;;  %v1276_v10 = vld [vmem:[%s2664_s1 + $0x58] sm:$0xff]  ;;  %v30_v12 = vld [vmem:[%s2665_s0 + $0x8] sm:$0xff] }
   0x6   :  { %1604 = vmatprep.subr.mxu1 %v1961_v0  ;;  %1574 = vmatpush3.msra.mxu0 %v1278_v5  ;;  %v47_v11 = vld [vmem:[%s2664_s1 + $0x18] sm:$0xff]  ;;  %32 = vst.msk [vmem:[#allocation2 + $0x2] sm:$0xff] %vm31_vm1, %v29_v9  ;;  %33 = vst.msk [vmem:[#allocation2 + $0xa] sm:$0xff] %vm31_vm1, %v30_v12  ;;  %v1271_v13 = vld [vmem:[%s2665_s0 + $0x10] sm:$0xff] }
   0x7   :  { %1605 = vmatpush3.msra.mxu1 %v49_v6  ;;  %1575 = vmatprep.subr.mxu0 %v1961_v0  ;;  %v1275_v14 = vld [vmem:[%s2664_s1 + $0x50] sm:$0xff]  ;;  %37 = vst.msk [vmem:[#allocation2 + $0x16] sm:$0xff] %vm31_vm1, %v1271_v13  ;;  %v1272_v16 = vld [vmem:[%s2665_s0 + $0x18] sm:$0xff]  ;;  %v1274_v17 = vld [vmem:[%s2664_s1 + $0x48] sm:$0xff] }
   0x8   :  { %1606 = vmatprep.subr.mxu1 %v1961_v0  ;;  %1576 = vmatpush3.msra.mxu0 %v1277_v7  ;;  %v46_v15 = vld [vmem:[%s2664_s1 + $0x10] sm:$0xff]  ;;  %v45_v18 = vld [vmem:[%s2664_s1 + $0x8] sm:$0xff]  ;;  %38 = vst.msk [vmem:[#allocation2 + $0x1e] sm:$0xff] %vm31_vm1, %v1272_v16  ;;  %v1273_v19 = vld [vmem:[%s2664_s1 + $0x40] sm:$0xff] }
   0x9   :  { %1607 = vmatpush3.msra.mxu1 %v48_v8  ;;  %1577 = vmatprep.subr.mxu0 %v1961_v0  ;;  %v44_v21 = vld [vmem:[%s2664_s1] sm:$0xff]  ;;  %v1298_v23 = vld [vmem:[%s2664_s1 + $0xb8] sm:$0xff]  ;;  %v1297_v25 = vld [vmem:[%s2664_s1 + $0xb0] sm:$0xff] }
   0xa   :  { %1608 = vmatprep.subr.mxu1 %v1961_v0  ;;  %1578 = vmatpush3.msra.mxu0 %v1276_v10  ;;  %v1296_v27 = vld [vmem:[%s2664_s1 + $0xa8] sm:$0xff]  ;;  %v1311_v28 = vld [vmem:[%s2664_s1 + $0xf8] sm:$0xff]  ;;  %v1295_v31 = vld [vmem:[%s2664_s1 + $0xa0] sm:$0xff] }
   0xb   :  { %1609 = vmatpush3.msra.mxu1 %v47_v11  ;;  %1579 = vmatprep.subr.mxu0 %v1961_v0  ;;  %v1310_v32 = vld [vmem:[%s2664_s1 + $0xf0] sm:$0xff]  ;;  %v1294_v33 = vld [vmem:[%s2664_s1 + $0x98] sm:$0xff]  ;;  %v1309_v34 = vld [vmem:[%s2664_s1 + $0xe8] sm:$0xff] }
   0xc   :  { %1610 = vmatprep.subr.mxu1 %v1961_v0  ;;  %1580 = vmatpush3.msra.mxu0 %v1275_v14  ;;  %v1308_v37 = vld [vmem:[%s2664_s1 + $0xe0] sm:$0xff]  ;;  %v1293_v38 = vld [vmem:[%s2664_s1 + $0x90] sm:$0xff]  ;;  %v1307_v39 = vld [vmem:[%s2664_s1 + $0xd8] sm:$0xff] }
   0xd   :  { %1611 = vmatpush3.msra.mxu1 %v46_v15  ;;  %1581 = vmatprep.subr.mxu0 %v1961_v0  ;;  %v52_v20 = vld [vmem:[#allocation2 + $0x1] sm:$0xff]  ;;  %v53_v24 = vld [vmem:[#allocation2 + $0x9] sm:$0xff]  ;;  %v1324_v48 = vld [vmem:[%s2664_s1 + $0x138] sm:$0xff] }
   0xe   :  { %1612 = vmatprep.subr.mxu1 %v1961_v0  ;;  %1582 = vmatpush3.msra.mxu0 %v1274_v17  ;;  %v39_v22 = vld [vmem:[#allocation2] sm:$0xff]  ;;  %v40_v26 = vld [vmem:[#allocation2 + $0x8] sm:$0xff]  ;;  %v54_v29 = vld [vmem:[#allocation2 + $0x11] sm:$0xff] }
   0xf   :  { %1613 = vmatpush3.msra.mxu1 %v45_v18  ;;  %1583 = vmatprep.subr.mxu0 %v1961_v0  ;;  %v41_v30 = vld [vmem:[#allocation2 + $0x10] sm:$0xff]  ;;  %v55_v35 = vld [vmem:[#allocation2 + $0x19] sm:$0xff]  ;;  %v56_v40 = vld [vmem:[#allocation2 + $0x21] sm:$0xf] }
  0x10   :  { %1584 = vmatpush3.msra.mxu0 %v1273_v19  ;;  %1614 = vmatprep.subr.mxu1 %v1961_v0  ;;  %v42_v36 = vld [vmem:[#allocation2 + $0x18] sm:$0xff]  ;;  %v1292_v41 = vld [vmem:[%s2664_s1 + $0x88] sm:$0xff]  ;;  %v43_v42 = vld [vmem:[#allocation2 + $0x20] sm:$0xf] }
  0x11   :  { %1586 = vmatmul.mubr.msk.f32.vlgmr.msra.gmra.mxu0 %vm31_vm1, %v52_v20  ;;  %1615 = vmatpush3.msra.mxu1 %v44_v21  ;;  %v1306_v43 = vld [vmem:[%s2664_s1 + $0xd0] sm:$0xff]  ;;  %v1291_v44 = vld [vmem:[%s2664_s1 + $0x80] sm:$0xff]  ;;  %v1305_v45 = vld [vmem:[%s2664_s1 + $0xc8] sm:$0xff] }
  0x12   :  { %1616 = vmatprep.mubr.msk.f32.mxu1 %vm1962_vm2, %v1961_v0  ;;  %1631 = vmatprep.subr.mxu0 %v1961_v0  ;;  %v276_v46 = vld [vmem:[#allocation2 + $0x2] sm:$0xff]  ;;  %v277_v50 = vld [vmem:[#allocation2 + $0xa] sm:$0xff]  ;;  %v278_v54 = vld [vmem:[#allocation2 + $0x12] sm:$0xff] }
  0x13   :  { %1617 = vmatmul.mubr.msk.f32.vlgmr.msra.gmra.mxu1 %vm31_vm1, %v39_v22  ;;  %1632 = vmatpush3.msra.mxu0 %v1298_v23  ;;  %v1304_v47 = vld [vmem:[%s2664_s1 + $0xc0] sm:$0xff]  ;;  %v1323_v51 = vld [vmem:[%s2664_s1 + $0x130] sm:$0xff]  ;;  %v1322_v53 = vld [vmem:[%s2664_s1 + $0x128] sm:$0xff] }
  0x14   :  { %1588 = vmatprep.mubr.msk.f32.mxu0 %vm1962_vm2, %v1961_v0  ;;  %1633 = vmatprep.subr.mxu0 %v1961_v0  ;;  %v400_v49 = vld [vmem:[#allocation2 + $0x3] sm:$0xff]  ;;  %v401_v52 = vld [vmem:[#allocation2 + $0xb] sm:$0xff]  ;;  %v402_v56 = vld [vmem:[#allocation2 + $0x13] sm:$0xff] }
  0x15   :  { %1589 = vmatmul.mubr.msk.f32.gmra.mxu0 %vm31_vm1, %v53_v24  ;;  %1619 = vmatprep.mubr.msk.f32.mxu1 %vm1962_vm2, %v1961_v0  ;;  %v1321_v55 = vld [vmem:[%s2664_s1 + $0x120] sm:$0xff]  ;;  %v1320_v57 = vld [vmem:[%s2664_s1 + $0x118] sm:$0xff]  ;;  %v1319_v59 = vld [vmem:[%s2664_s1 + $0x110] sm:$0xff] }
  0x16   :  { %1634 = vmatpush3.msra.mxu0 %v1297_v25  ;;  %1662 = vmatprep.subr.mxu1 %v1961_v0  ;;  %v279_v58 = vld [vmem:[#allocation2 + $0x1a] sm:$0xff]  ;;  %v1318_v61 = vld [vmem:[%s2664_s1 + $0x108] sm:$0xff]  ;;  %v280_v62 = vld [vmem:[#allocation2 + $0x22] sm:$0xf] }
  0x17   :  { %1620 = vmatmul.mubr.msk.f32.gmra.mxu1 %vm31_vm1, %v40_v26  ;;  %1635 = vmatprep.subr.mxu0 %v1961_v0  ;;  %v403_v60 = vld [vmem:[#allocation2 + $0x1b] sm:$0xff]  ;;  %v404_v1 = vld [vmem:[#allocation2 + $0x23] sm:$0xf]  ;;  %v525_v3 = vld [vmem:[#allocation2 + $0xc] sm:$0xff] }
  0x18   :  { %1636 = vmatpush3.msra.mxu0 %v1296_v27  ;;  %1591 = vmatprep.mubr.msk.f32.mxu0 %vm1962_vm2, %v1961_v0  ;;  %v1317_v63 = vld [vmem:[%s2664_s1 + $0x100] sm:$0xff]  ;;  %v526_v4 = vld [vmem:[#allocation2 + $0x14] sm:$0xff]  ;;  %v1344_v11 = vld [vmem:[%s2666_s3 + $0xe8] sm:$0xff] }
  0x19   :  { %1663 = vmatpush3.msra.mxu1 %v1311_v28  ;;  %1592 = vmatmul.mubr.msk.f32.gmra.mxu0 %vm31_vm1, %v54_v29  ;;  %v524_v2 = vld [vmem:[#allocation2 + $0x4] sm:$0xff]  ;;  %v527_v5 = vld [vmem:[#allocation2 + $0x1c] sm:$0xff]  ;;  %v1345_v9 = vld [vmem:[%s2666_s3 + $0xf0] sm:$0xff] }
  0x1a   :  { %1622 = vmatprep.mubr.msk.f32.mxu1 %vm1962_vm2, %v1961_v0  ;;  %1637 = vmatprep.subr.mxu0 %v1961_v0  ;;  %v528_v6 = vld [vmem:[#allocation2 + $0x24] sm:$0xf]  ;;  %v1346_v7 = vld [vmem:[%s2666_s3 + $0xf8] sm:$0xff]  ;;  %v689_v10 = vld [vmem:[%s2666_s3 + $0x70] sm:$0xff] }
  0x1b   :  { %1664 = vmatprep.subr.mxu1 %v1961_v0  ;;  %1623 = vmatmul.mubr.msk.f32.gmra.mxu1 %vm31_vm1, %v41_v30  ;;  %v690_v8 = vld [vmem:[%s2666_s3 + $0x78] sm:$0xff]  ;;  %v688_v12 = vld [vmem:[%s2666_s3 + $0x68] sm:$0xff]  ;;  %v1343_v13 = vld [vmem:[%s2666_s3 + $0xe0] sm:$0xff] }
  0x1c   :  { %1638 = vmatpush3.msra.mxu0 %v1295_v31  ;;  %1665 = vmatpush3.msra.mxu1 %v1310_v32  ;;  %v687_v14 = vld [vmem:[%s2666_s3 + $0x60] sm:$0xff]  ;;  %v1342_v15 = vld [vmem:[%s2666_s3 + $0xd8] sm:$0xff]  ;;  %v1341_v17 = vld [vmem:[%s2666_s3 + $0xd0] sm:$0xff] }
  0x1d   :  { %1639 = vmatprep.subr.mxu0 %v1961_v0  ;;  %1666 = vmatprep.subr.mxu1 %v1961_v0  ;;  %v686_v16 = vld [vmem:[%s2666_s3 + $0x58] sm:$0xff]  ;;  %v685_v18 = vld [vmem:[%s2666_s3 + $0x50] sm:$0xff]  ;;  %v1340_v19 = vld [vmem:[%s2666_s3 + $0xc8] sm:$0xff] }
  0x1e   :  { %1594 = vmatprep.mubr.msk.f32.mxu0 %vm1962_vm2, %v1961_v0  ;;  %1640 = vmatpush3.msra.mxu0 %v1294_v33  ;;  %v684_v20 = vld [vmem:[%s2666_s3 + $0x48] sm:$0xff]  ;;  %v1339_v21 = vld [vmem:[%s2666_s3 + $0xc0] sm:$0xff]  ;;  %v1338_v23 = vld [vmem:[%s2666_s3 + $0xb8] sm:$0xff] }
  0x1f   :  { %1667 = vmatpush3.msra.mxu1 %v1309_v34  ;;  %1595 = vmatmul.mubr.msk.f32.gmra.mxu0 %vm31_vm1, %v55_v35  ;;  %v683_v22 = vld [vmem:[%s2666_s3 + $0x40] sm:$0xff]  ;;  %v682_v24 = vld [vmem:[%s2666_s3 + $0x38] sm:$0xff]  ;;  %v1337_v25 = vld [vmem:[%s2666_s3 + $0xb0] sm:$0xff] }
  0x20   :  { %1625 = vmatprep.mubr.msk.f32.mxu1 %vm1962_vm2, %v1961_v0  ;;  %1668 = vmatprep.subr.mxu1 %v1961_v0  ;;  %v681_v26 = vld [vmem:[%s2666_s3 + $0x30] sm:$0xff]  ;;  %v1336_v27 = vld [vmem:[%s2666_s3 + $0xa8] sm:$0xff]  ;;  %v1335_v29 = vld [vmem:[%s2666_s3 + $0xa0] sm:$0xff] }
  0x21   :  { %1626 = vmatmul.mubr.msk.f32.gmra.mxu1 %vm31_vm1, %v42_v36  ;;  %1641 = vmatprep.subr.mxu0 %v1961_v0  ;;  %v680_v28 = vld [vmem:[%s2666_s3 + $0x28] sm:$0xff]  ;;  %v679_v30 = vld [vmem:[%s2666_s3 + $0x20] sm:$0xff]  ;;  %v1334_v31 = vld [vmem:[%s2666_s3 + $0x98] sm:$0xff] }
  0x22   :  { %1669 = vmatpush3.msra.mxu1 %v1308_v37  ;;  %1642 = vmatpush3.msra.mxu0 %v1293_v38  ;;  %v678_v32 = vld [vmem:[%s2666_s3 + $0x18] sm:$0xff]  ;;  %v1333_v33 = vld [vmem:[%s2666_s3 + $0x90] sm:$0xff]  ;;  %v1332_v35 = vld [vmem:[%s2666_s3 + $0x88] sm:$0xff] }
  0x23   :  { %1670 = vmatprep.subr.mxu1 %v1961_v0  ;;  %1597 = vmatprep.mubr.msk.f32.mxu0 %vm1962_vm2, %v1961_v0  ;;  %v677_v34 = vld [vmem:[%s2666_s3 + $0x10] sm:$0xff]  ;;  %v676_v36 = vld [vmem:[%s2666_s3 + $0x8] sm:$0xff]  ;;  %v1331_v37 = vld [vmem:[%s2666_s3 + $0x80] sm:$0xff] }
  0x24   :  { %1643 = vmatprep.subr.mxu0 %v1961_v0  ;;  %1671 = vmatpush3.msra.mxu1 %v1307_v39  ;;  %v675_v38 = vld [vmem:[%s2666_s3] sm:$0xff] }
  0x25   :  { %1598 = vmatmul.mubr.msk.f32.gmra.mxu0 %vm31_vm1, %v56_v40  ;;  %1628 = vmatprep.mubr.msk.f32.mxu1 %vm1962_vm2, %v1961_v0 }
  0x26   :  { %1644 = vmatpush3.msra.mxu0 %v1292_v41  ;;  %1672 = vmatprep.subr.mxu1 %v1961_v0 }
  0x27   :  { %1629 = vmatmul.mubr.msk.f32.gmra.mxu1 %vm31_vm1, %v43_v42  ;;  %1645 = vmatprep.subr.mxu0 %v1961_v0 }
  0x28   :  { %1673 = vmatpush3.msra.mxu1 %v1306_v43  ;;  %1646 = vmatpush3.msra.mxu0 %v1291_v44 }
  0x29   :  { %1674 = vmatprep.subr.mxu1 %v1961_v0  ;;  %1647 = vmatprep.mubr.msk.f32.mxu0 %vm1962_vm2, %v1961_v0 }
  0x2a   :  { %1675 = vmatpush3.msra.mxu1 %v1305_v45  ;;  %1648 = vmatmul.mubr.msk.f32.vlgmr.msra.gmra.mxu0 %vm31_vm1, %v276_v46 }
  0x2b   :  { %1676 = vmatprep.subr.mxu1 %v1961_v0  ;;  %1693 = vmatprep.subr.mxu0 %v1961_v0 }
  0x2c   :  { %1677 = vmatpush3.msra.mxu1 %v1304_v47  ;;  %1678 = vmatprep.mubr.msk.f32.mxu1 %vm1962_vm2, %v1961_v0 }
  0x2d   :  { %1694 = vmatpush3.msra.mxu0 %v1324_v48  ;;  %1679 = vmatmul.mubr.msk.f32.vlgmr.msra.gmra.mxu1 %vm31_vm1, %v400_v49 }
  0x2e   :  { %1650 = vmatprep.mubr.msk.f32.mxu0 %vm1962_vm2, %v1961_v0  ;;  %1695 = vmatprep.subr.mxu0 %v1961_v0 }
  0x2f   :  { %1651 = vmatmul.mubr.msk.f32.gmra.mxu0 %vm31_vm1, %v277_v50  ;;  %1681 = vmatprep.mubr.msk.f32.mxu1 %vm1962_vm2, %v1961_v0 }
  0x30   :  { %1696 = vmatpush3.msra.mxu0 %v1323_v51  ;;  %1653 = vmatprep.mubr.msk.f32.mxu0 %vm1962_vm2, %v1961_v0 }
  0x31   :  { %1697 = vmatprep.subr.mxu0 %v1961_v0  ;;  %1682 = vmatmul.mubr.msk.f32.gmra.mxu1 %vm31_vm1, %v401_v52 }
  0x32   :  { %1698 = vmatpush3.msra.mxu0 %v1322_v53  ;;  %1684 = vmatprep.mubr.msk.f32.mxu1 %vm1962_vm2, %v1961_v0 }
  0x33   :  { %1654 = vmatmul.mubr.msk.f32.gmra.mxu0 %vm31_vm1, %v278_v54  ;;  %1699 = vmatprep.subr.mxu0 %v1961_v0 }
  0x34   :  { %1700 = vmatpush3.msra.mxu0 %v1321_v55  ;;  %1656 = vmatprep.mubr.msk.f32.mxu0 %vm1962_vm2, %v1961_v0 }
  0x35   :  { %1685 = vmatmul.mubr.msk.f32.gmra.mxu1 %vm31_vm1, %v402_v56  ;;  %1701 = vmatprep.subr.mxu0 %v1961_v0 }
  0x36   :  { %1702 = vmatpush3.msra.mxu0 %v1320_v57  ;;  %1687 = vmatprep.mubr.msk.f32.mxu1 %vm1962_vm2, %v1961_v0 }
  0x37   :  { %1657 = vmatmul.mubr.msk.f32.gmra.mxu0 %vm31_vm1, %v279_v58  ;;  %1703 = vmatprep.subr.mxu0 %v1961_v0 }
  0x38   :  { %1704 = vmatpush3.msra.mxu0 %v1319_v59  ;;  %1659 = vmatprep.mubr.msk.f32.mxu0 %vm1962_vm2, %v1961_v0 }
  0x39   :  { %1688 = vmatmul.mubr.msk.f32.gmra.mxu1 %vm31_vm1, %v403_v60  ;;  %1705 = vmatprep.subr.mxu0 %v1961_v0 }
  0x3a   :  { %1706 = vmatpush3.msra.mxu0 %v1318_v61  ;;  %1690 = vmatprep.mubr.msk.f32.mxu1 %vm1962_vm2, %v1961_v0 }
  0x3b   :  { %1660 = vmatmul.mubr.msk.f32.gmra.mxu0 %vm31_vm1, %v280_v62  ;;  %1707 = vmatprep.subr.mxu0 %v1961_v0 }
  0x3c   :  { %1708 = vmatpush3.msra.mxu0 %v1317_v63  ;;  %1709 = vmatprep.mubr.msk.f32.mxu0 %vm1962_vm2, %v1961_v0 }
  0x3d   :  { %1691 = vmatmul.mubr.msk.f32.gmra.mxu1 %vm31_vm1, %v404_v1  ;;  %1724 = vmatprep.subr.mxu1 %v1961_v0 }
  0x3e   :  { %1771 = vmatprep.subr.mxu0 %v1961_v0  ;;  %1756 = vmatprep.mubr.msk.f32.mxu1 %vm1962_vm2, %v1961_v0 }
  0x3f   :  { %1710 = vmatmul.mubr.msk.f32.vlgmr.msra.gmra.mxu0 %vm31_vm1, %v524_v2  ;;  %1725 = vmatpush3.msra.mxu1 %v1346_v7 }
  0x40   :  { %1712 = vmatprep.mubr.msk.f32.mxu0 %vm1962_vm2, %v1961_v0  ;;  %1772 = vmatpush3.msra.mxu0 %v690_v8 }
  0x41   :  { %1726 = vmatprep.subr.mxu1 %v1961_v0  ;;  %1773 = vmatprep.subr.mxu0 %v1961_v0 }
  0x42   :  { %1727 = vmatpush3.msra.mxu1 %v1345_v9  ;;  %1774 = vmatpush3.msra.mxu0 %v689_v10 }
  0x43   :  { %1713 = vmatmul.mubr.msk.f32.gmra.mxu0 %vm31_vm1, %v525_v3  ;;  %1728 = vmatprep.subr.mxu1 %v1961_v0 }
  0x44   :  { %1715 = vmatprep.mubr.msk.f32.mxu0 %vm1962_vm2, %v1961_v0  ;;  %1775 = vmatprep.subr.mxu0 %v1961_v0 }
  0x45   :  { %1729 = vmatpush3.msra.mxu1 %v1344_v11  ;;  %1776 = vmatpush3.msra.mxu0 %v688_v12 }
  0x46   :  { %1730 = vmatprep.subr.mxu1 %v1961_v0  ;;  %1777 = vmatprep.subr.mxu0 %v1961_v0 }
  0x47   :  { %1716 = vmatmul.mubr.msk.f32.gmra.mxu0 %vm31_vm1, %v526_v4  ;;  %1731 = vmatpush3.msra.mxu1 %v1343_v13 }
  0x48   :  { %1718 = vmatprep.mubr.msk.f32.mxu0 %vm1962_vm2, %v1961_v0  ;;  %1778 = vmatpush3.msra.mxu0 %v687_v14 }
  0x49   :  { %1732 = vmatprep.subr.mxu1 %v1961_v0  ;;  %1779 = vmatprep.subr.mxu0 %v1961_v0 }
  0x4a   :  { %1733 = vmatpush3.msra.mxu1 %v1342_v15  ;;  %1780 = vmatpush3.msra.mxu0 %v686_v16 }
  0x4b   :  { %1719 = vmatmul.mubr.msk.f32.gmra.mxu0 %vm31_vm1, %v527_v5  ;;  %1734 = vmatprep.subr.mxu1 %v1961_v0 }
  0x4c   :  { %1721 = vmatprep.mubr.msk.f32.mxu0 %vm1962_vm2, %v1961_v0  ;;  %1781 = vmatprep.subr.mxu0 %v1961_v0 }
  0x4d   :  { %1735 = vmatpush3.msra.mxu1 %v1341_v17  ;;  %1782 = vmatpush3.msra.mxu0 %v685_v18 }
  0x4e   :  { %1736 = vmatprep.subr.mxu1 %v1961_v0  ;;  %1783 = vmatprep.subr.mxu0 %v1961_v0 }
  0x4f   :  { %1722 = vmatmul.mubr.msk.f32.gmra.mxu0 %vm31_vm1, %v528_v6  ;;  %1737 = vmatpush3.msra.mxu1 %v1340_v19 }
  0x50   :  { %1803 = vmatprep.mubr.msk.f32.mxu0 %vm1962_vm2, %v1961_v0  ;;  %1784 = vmatpush3.msra.mxu0 %v684_v20 }
  0x51   :  { %1738 = vmatprep.subr.mxu1 %v1961_v0  ;;  %1785 = vmatprep.subr.mxu0 %v1961_v0 }
  0x52   :  { %1739 = vmatpush3.msra.mxu1 %v1339_v21  ;;  %1786 = vmatpush3.msra.mxu0 %v683_v22  ;;  %v1330_v21 = vld [vmem:[%s2667_s2] ss:$0 sm:$0xff] }
  0x53   :  { %1740 = vmatprep.subr.mxu1 %v1961_v0  ;;  %1787 = vmatprep.subr.mxu0 %v1961_v0 }
  0x54   :  { %1741 = vmatpush3.msra.mxu1 %v1338_v23  ;;  %1788 = vmatpush3.msra.mxu0 %v682_v24 }
  0x55   :  { %1742 = vmatprep.subr.mxu1 %v1961_v0  ;;  %1789 = vmatprep.subr.mxu0 %v1961_v0 }
  0x56   :  { %1743 = vmatpush3.msra.mxu1 %v1337_v25  ;;  %1790 = vmatpush3.msra.mxu0 %v681_v26 }
  0x57   :  { %1744 = vmatprep.subr.mxu1 %v1961_v0  ;;  %1791 = vmatprep.subr.mxu0 %v1961_v0 }
  0x58   :  { %1745 = vmatpush3.msra.mxu1 %v1336_v27  ;;  %1792 = vmatpush3.msra.mxu0 %v680_v28 }
  0x59   :  { %1746 = vmatprep.subr.mxu1 %v1961_v0  ;;  %1793 = vmatprep.subr.mxu0 %v1961_v0 }
  0x5a   :  { %1747 = vmatpush3.msra.mxu1 %v1335_v29  ;;  %1794 = vmatpush3.msra.mxu0 %v679_v30 }
  0x5b   :  { %1748 = vmatprep.subr.mxu1 %v1961_v0  ;;  %1795 = vmatprep.subr.mxu0 %v1961_v0 }
  0x5c   :  { %1749 = vmatpush3.msra.mxu1 %v1334_v31  ;;  %1796 = vmatpush3.msra.mxu0 %v678_v32 }
  0x5d   :  { %1750 = vmatprep.subr.mxu1 %v1961_v0  ;;  %1797 = vmatprep.subr.mxu0 %v1961_v0 }
  0x5e   :  { %1751 = vmatpush3.msra.mxu1 %v1333_v33  ;;  %1798 = vmatpush3.msra.mxu0 %v677_v34 }
  0x5f   :  { %1752 = vmatprep.subr.mxu1 %v1961_v0  ;;  %1799 = vmatprep.subr.mxu0 %v1961_v0 }
  0x60   :  { %1753 = vmatpush3.msra.mxu1 %v1332_v35  ;;  %1800 = vmatpush3.msra.mxu0 %v676_v36 }
  0x61   :  { %1754 = vmatprep.subr.mxu1 %v1961_v0  ;;  %1801 = vmatprep.subr.mxu0 %v1961_v0 }
  0x62   :  { %1755 = vmatpush3.msra.mxu1 %v1331_v37  ;;  %1802 = vmatpush3.msra.mxu0 %v675_v38 }
  0x63   :  { %1818 = vmatprep.subr.mxu1 %v1961_v0  ;;  %1865 = vmatprep.subr.mxu0 %v1961_v0 }
  0xd1   :  { %v147_v39 = vpop.f32.mrf.mxu0 }
  0xd3   :  { %v252_v40 = vpop.f32.mrf.mxu1  ;;  %v1587_v41 = vpop.f32.mrf.mxu0 }
  0xd4   :  { %v253_v9 = vadd.f32 %v252_v40, %v147_v39 }
  0xd5   :  { %v1618_v42 = vpop.f32.mrf.mxu1  ;;  %v152_v43 = vpop.f32.mrf.mxu0 }
  0xd7   :  { %v257_v44 = vpop.f32.mrf.mxu1  ;;  %v1590_v45 = vpop.f32.mrf.mxu0 }
  0xd8   :  { %v258_v15 = vadd.f32 %v257_v44, %v152_v43 }
  0xd9   :  { %v1621_v46 = vpop.f32.mrf.mxu1  ;;  %v157_v47 = vpop.f32.mrf.mxu0 }
  0xdb   :  { %v262_v48 = vpop.f32.mrf.mxu1  ;;  %v1593_v49 = vpop.f32.mrf.mxu0 }
  0xdc   :  { %v263_v23 = vadd.f32 %v262_v48, %v157_v47  ;;  %v1362_v48 = vld [vmem:[%s2666_s3 + $0x178] sm:$0xff] }
  0xdd   :  { %v1624_v50 = vpop.f32.mrf.mxu1  ;;  %v1378_v49 = vld [vmem:[%s2666_s3 + $0x1f8] sm:$0xff] }
  0xdf   :  { %v162_v51 = vpop.f32.mrf.mxu0 }
  0xe1   :  { %v267_v52 = vpop.f32.mrf.mxu1  ;;  %v1596_v53 = vpop.f32.mrf.mxu0 }
  0xe2   :  { %v268_v30 = vadd.f32 %v267_v52, %v162_v51 }
  0xe3   :  { %v1627_v54 = vpop.f32.mrf.mxu1 }
  0xe5   :  { %v167_v55 = vpop.f32.mrf.mxu0 }
  0xe7   :  { %v272_v56 = vpop.f32.mrf.mxu1  ;;  %v1599_v57 = vpop.f32.mrf.mxu0 }
  0xe8   :  { %v273_v38 = vadd.f32 %v272_v56, %v167_v55  ;;  %v1361_v55 = vld [vmem:[%s2666_s3 + $0x170] sm:$0xff] }
  0xe9   :  { %v1630_v58 = vpop.f32.mrf.mxu1  ;;  %v1377_v56 = vld [vmem:[%s2666_s3 + $0x1f0] sm:$0xff] }
  0xea   :  { %v371_v59 = vpop.f32.mrf.mxu0 }
  0xeb   :  { %v395_v12 = vadd.f32 %v371_v59, %v253_v9  ;;  %v1374_v9 = vld [vmem:[%s2666_s3 + $0x1d8] sm:$0xff] }
  0xec   :  { %v1649_v60 = vpop.f32.mrf.mxu0 }
  0xed   :  { %v495_v61 = vpop.f32.mrf.mxu1 }
  0xee   :  { %v519_v18 = vadd.f32 %v495_v61, %v395_v12 }
  0xef   :  { %v376_v62 = vpop.f32.mrf.mxu0  ;;  %v1680_v63 = vpop.f32.mrf.mxu1 }
  0xf0   :  { %v396_v19 = vadd.f32 %v376_v62, %v258_v15  ;;  %v1372_v15 = vld [vmem:[%s2666_s3 + $0x1c8] sm:$0xff] }
  0xf1   :  { %v1652_v1 = vpop.f32.mrf.mxu0  ;;  %v500_v2 = vpop.f32.mrf.mxu1 }
  0xf2   :  { %v520_v26 = vadd.f32 %v500_v2, %v396_v19  ;;  %v1360_v1 = vld [vmem:[%s2666_s3 + $0x168] sm:$0xff] }
  0xf3   :  { %v381_v3 = vpop.f32.mrf.mxu0  ;;  %v1683_v4 = vpop.f32.mrf.mxu1  ;;  %v1376_v2 = vld [vmem:[%s2666_s3 + $0x1e8] sm:$0xff] }
  0xf4   :  { %v397_v27 = vadd.f32 %v381_v3, %v263_v23  ;;  %v1359_v4 = vld [vmem:[%s2666_s3 + $0x160] sm:$0xff]  ;;  %v1369_v23 = vld [vmem:[%s2666_s3 + $0x1b0] sm:$0xff] }
  0xf5   :  { %v1655_v5 = vpop.f32.mrf.mxu0  ;;  %v505_v6 = vpop.f32.mrf.mxu1 }
  0xf6   :  { %v521_v34 = vadd.f32 %v505_v6, %v397_v27  ;;  %v1375_v5 = vld [vmem:[%s2666_s3 + $0x1e0] sm:$0xff] }
  0xf7   :  { %v386_v7 = vpop.f32.mrf.mxu0  ;;  %v1686_v8 = vpop.f32.mrf.mxu1  ;;  %v1367_v27 = vld [vmem:[%s2666_s3 + $0x1a0] sm:$0xff] }
  0xf8   :  { %v398_v35 = vadd.f32 %v386_v7, %v268_v30  ;;  %v1358_v8 = vld [vmem:[%s2666_s3 + $0x158] sm:$0xff] }
  0xf9   :  { %v1658_v10 = vpop.f32.mrf.mxu0  ;;  %v510_v11 = vpop.f32.mrf.mxu1  ;;  %v1366_v30 = vld [vmem:[%s2666_s3 + $0x198] sm:$0xff] }
  0xfa   :  { %v522_v42 = vadd.f32 %v510_v11, %v398_v35  ;;  %v1357_v10 = vld [vmem:[%s2666_s3 + $0x150] sm:$0xff]  ;;  %v1364_v35 = vld [vmem:[%s2666_s3 + $0x188] sm:$0xff] }
  0xfb   :  { %v391_v13 = vpop.f32.mrf.mxu0  ;;  %v1689_v14 = vpop.f32.mrf.mxu1  ;;  %v1373_v11 = vld [vmem:[%s2666_s3 + $0x1d0] sm:$0xff] }
  0xfc   :  { %v399_v43 = vadd.f32 %v391_v13, %v273_v38  ;;  %v1356_v14 = vld [vmem:[%s2666_s3 + $0x148] sm:$0xff]  ;;  %v1363_v38 = vld [vmem:[%s2666_s3 + $0x180] sm:$0xff] }
  0xfd   :  { %v1661_v16 = vpop.f32.mrf.mxu0  ;;  %v515_v17 = vpop.f32.mrf.mxu1 }
  0xfe   :  { %v523_v53 = vadd.f32 %v515_v17, %v399_v43  ;;  %v1355_v16 = vld [vmem:[%s2666_s3 + $0x140] sm:$0xff] }
  0xff   :  { %v619_v20 = vpop.f32.mrf.mxu0  ;;  %v1692_v22 = vpop.f32.mrf.mxu1  ;;  %v1371_v17 = vld [vmem:[%s2666_s3 + $0x1c0] sm:$0xff] }
 0x100   :  { %v643_v24 = vadd.f32 %v619_v20, %v519_v18  ;;  %v1354_v20 = vld [vmem:[%s2666_s3 + $0x138] sm:$0xff]  ;;  %v1353_v22 = vld [vmem:[%s2666_s3 + $0x130] sm:$0xff] }
 0x101   :  { %v1711_v25 = vpop.f32.mrf.mxu0 }
 0x102   :  { %v2389_v28 = vadd.f32 %v1330_v21, %v643_v24  ;;  %v1352_v24 = vld [vmem:[%s2666_s3 + $0x128] sm:$0xff] }
 0x103   :  { %v624_v29 = vpop.f32.mrf.mxu0  ;;  %v1368_v25 = vld [vmem:[%s2666_s3 + $0x1a8] sm:$0xff] }
 0x104   :  { %v660_v31 = vmax.f32 %v2389_v28, 0.0  ;;  %v644_v32 = vadd.f32 %v624_v29, %v520_v26  ;;  %v1351_v26 = vld [vmem:[%s2666_s3 + $0x120] sm:$0xff]  ;;  %v1350_v29 = vld [vmem:[%s2666_s3 + $0x118] sm:$0xff]  ;;  %v1392_v28 = vld [vmem:[%s2666_s3 + $0x268] sm:$0xff] }
 0x105   :  { %v1714_v33 = vpop.f32.mrf.mxu0 }
 0x106   :  { %665 = vst [vmem:[#allocation3 + $0x2] sm:$0xff] %v660_v31  ;;  %v2394_v36 = vadd.f32 %v1330_v21, %v644_v32  ;;  %v1349_v32 = vld [vmem:[%s2666_s3 + $0x110] sm:$0xff] }
 0x107   :  { %v629_v37 = vpop.f32.mrf.mxu0  ;;  %v1365_v33 = vld [vmem:[%s2666_s3 + $0x190] sm:$0xff] }
 0x108   :  { %v661_v39 = vmax.f32 %v2394_v36, 0.0  ;;  %v645_v40 = vadd.f32 %v629_v37, %v521_v34  ;;  %v1348_v34 = vld [vmem:[%s2666_s3 + $0x108] sm:$0xff]  ;;  %v1347_v37 = vld [vmem:[%s2666_s3 + $0x100] sm:$0xff]  ;;  %v1390_v36 = vld [vmem:[%s2666_s3 + $0x258] sm:$0xff] }
 0x109   :  { %v1717_v41 = vpop.f32.mrf.mxu0 }
 0x10a   :  { %666 = vst [vmem:[#allocation3 + $0xa] sm:$0xff] %v661_v39  ;;  %v657_v44 = vadd.f32 %v1330_v21, %v645_v40  ;;  %v1394_v41 = vld [vmem:[%s2666_s3 + $0x278] sm:$0xff] }
 0x10b   :  { %v634_v45 = vpop.f32.mrf.mxu0 }
 0x10c   :  { %v662_v46 = vmax.f32 %v657_v44, 0.0  ;;  %v646_v47 = vadd.f32 %v634_v45, %v522_v42  ;;  %v1393_v42 = vld [vmem:[%s2666_s3 + $0x270] sm:$0xff] }
 0x10d   :  { %v1720_v50 = vpop.f32.mrf.mxu0  ;;  %v691_v51 = vld [vmem:[#allocation3 + $0x1] sm:$0xff] }
 0x10e   :  { %v670_v52 = vld [vmem:[#allocation3] sm:$0xff]  ;;  %667 = vst [vmem:[#allocation3 + $0x12] sm:$0xf0] %v662_v46  ;;  %v2405_v54 = vadd.f32 %v1330_v21, %v646_v47  ;;  %1757 = vmatmul.mubr.f32.vlgmr.msra.gmra.mxu1 %v691_v51  ;;  %v1389_v45 = vld [vmem:[%s2666_s3 + $0x250] sm:$0xff]  ;;  %v1386_v50 = vld [vmem:[%s2666_s3 + $0x238] sm:$0xff] }
 0x10f   :  { %1804 = vmatmul.mubr.f32.vlgmr.msra.gmra.mxu0 %v670_v52  ;;  %1819 = vmatpush3.msra.mxu1 %v1362_v48  ;;  %v639_v57 = vpop.f32.mrf.mxu0  ;;  %v1388_v47 = vld [vmem:[%s2666_s3 + $0x248] sm:$0xff]  ;;  %v1387_v48 = vld [vmem:[%s2666_s3 + $0x240] sm:$0xff]  ;;  %v1385_v52 = vld [vmem:[%s2666_s3 + $0x230] sm:$0xff] }
 0x110   :  { %1866 = vmatpush3.msra.mxu0 %v1378_v49  ;;  %v663_v58 = vmax.f32 %v2405_v54, 0.0  ;;  %v647_v59 = vadd.f32 %v639_v57, %v523_v53  ;;  %1820 = vmatprep.subr.mxu1 %v1961_v0  ;;  %v1384_v53 = vld [vmem:[%s2666_s3 + $0x228] sm:$0xff]  ;;  %v1383_v54 = vld [vmem:[%s2666_s3 + $0x220] sm:$0xff] }
 0x111   :  { %1867 = vmatprep.subr.mxu0 %v1961_v0  ;;  %1821 = vmatpush3.msra.mxu1 %v1361_v55  ;;  %v692_v60 = vld [vmem:[#allocation3 + $0x9] sm:$0xff]  ;;  %v1723_v62 = vpop.f32.mrf.mxu0  ;;  %v1380_v57 = vld [vmem:[%s2666_s3 + $0x208] sm:$0xff] }
 0x112   :  { %1868 = vmatpush3.msra.mxu0 %v1377_v56  ;;  %v671_v61 = vld [vmem:[#allocation3 + $0x8] sm:$0xff]  ;;  %668 = vst [vmem:[#allocation3 + $0x1a] sm:$0xff] %v663_v58  ;;  %v659_v63 = vadd.f32 %v1330_v21, %v647_v59  ;;  %1759 = vmatprep.mubr.msk.f32.mxu1 %vm1962_vm2, %v1961_v0  ;;  %v1370_v21 = vld [vmem:[%s2666_s3 + $0x1b8] sm:$0xff] }
 0x113   :  { %1806 = vmatprep.mubr.msk.f32.mxu0 %vm1962_vm2, %v1961_v0  ;;  %1822 = vmatprep.subr.mxu1 %v1961_v0  ;;  %v1010_v40 = vld [vmem:[#allocation3 + $0x3] sm:$0xff]  ;;  %v1011_v43 = vld [vmem:[#allocation3 + $0xb] sm:$0xff] }
 0x114   :  { %1869 = vmatprep.subr.mxu0 %v1961_v0  ;;  %v664_v3 = vmax.f32 %v659_v63, 0.0  ;;  %1760 = vmatmul.mubr.f32.gmra.mxu1 %v692_v60  ;;  %v1382_v55 = vld [vmem:[%s2666_s3 + $0x218] sm:$0xff]  ;;  %v1381_v56 = vld [vmem:[%s2666_s3 + $0x210] sm:$0xff] }
 0x115   :  { %1807 = vmatmul.mubr.f32.gmra.mxu0 %v671_v61  ;;  %1823 = vmatpush3.msra.mxu1 %v1360_v1  ;;  %v693_v6 = vld [vmem:[#allocation3 + $0x11] sm:$0xff]  ;;  %v1127_v59 = vld [vmem:[#allocation3 + $0x4] sm:$0xff] }
 0x116   :  { %1870 = vmatpush3.msra.mxu0 %v1376_v2  ;;  %669 = vst [vmem:[#allocation3 + $0x22] sm:$0xf] %v664_v3  ;;  %1824 = vmatprep.subr.mxu1 %v1961_v0  ;;  %v672_v7 = vld [vmem:[#allocation3 + $0x10] sm:$0xff] }
 0x117   :  { %1871 = vmatprep.subr.mxu0 %v1961_v0  ;;  %1825 = vmatpush3.msra.mxu1 %v1359_v4  ;;  %v1128_v60 = vld [vmem:[#allocation3 + $0xc] sm:$0xff] }
 0x118   :  { %1872 = vmatpush3.msra.mxu0 %v1375_v5  ;;  %1762 = vmatprep.mubr.msk.f32.mxu1 %vm1962_vm2, %v1961_v0 }
 0x119   :  { %1809 = vmatprep.mubr.msk.f32.mxu0 %vm1962_vm2, %v1961_v0  ;;  %1826 = vmatprep.subr.mxu1 %v1961_v0  ;;  %v694_v12 = vld [vmem:[#allocation3 + $0x19] sm:$0xff] }
 0x11a   :  { %1873 = vmatprep.subr.mxu0 %v1961_v0  ;;  %1763 = vmatmul.mubr.f32.gmra.mxu1 %v693_v6  ;;  %v673_v13 = vld [vmem:[#allocation3 + $0x18] sm:$0xff] }
 0x11b   :  { %1810 = vmatmul.mubr.f32.gmra.mxu0 %v672_v7  ;;  %1827 = vmatpush3.msra.mxu1 %v1358_v8  ;;  %v1012_v44 = vld [vmem:[#allocation3 + $0x13] sm:$0xff] }
 0x11c   :  { %1874 = vmatpush3.msra.mxu0 %v1374_v9  ;;  %1828 = vmatprep.subr.mxu1 %v1961_v0  ;;  %v1129_v61 = vld [vmem:[#allocation3 + $0x14] sm:$0xff] }
 0x11d   :  { %1875 = vmatprep.subr.mxu0 %v1961_v0  ;;  %1829 = vmatpush3.msra.mxu1 %v1357_v10  ;;  %v695_v18 = vld [vmem:[#allocation3 + $0x21] sm:$0xf] }
 0x11e   :  { %1876 = vmatpush3.msra.mxu0 %v1373_v11  ;;  %1765 = vmatprep.mubr.msk.f32.mxu1 %vm1962_vm2, %v1961_v0  ;;  %v674_v19 = vld [vmem:[#allocation3 + $0x20] sm:$0xf]  ;;  %v1131_v63 = vld [vmem:[#allocation3 + $0x24] sm:$0xf] }
 0x11f   :  { %1812 = vmatprep.mubr.msk.f32.mxu0 %vm1962_vm2, %v1961_v0  ;;  %1830 = vmatprep.subr.mxu1 %v1961_v0  ;;  %v1013_v46 = vld [vmem:[#allocation3 + $0x1b] sm:$0xff]  ;;  %v1014_v49 = vld [vmem:[#allocation3 + $0x23] sm:$0xf] }
 0x120   :  { %1877 = vmatprep.subr.mxu0 %v1961_v0  ;;  %1766 = vmatmul.mubr.f32.gmra.mxu1 %v694_v12  ;;  %v897_v51 = vld [vmem:[#allocation3 + $0x22] sm:$0xf] }
 0x121   :  { %1813 = vmatmul.mubr.f32.gmra.mxu0 %v673_v13  ;;  %1831 = vmatpush3.msra.mxu1 %v1356_v14  ;;  %v1130_v62 = vld [vmem:[#allocation3 + $0x1c] sm:$0xff] }
 0x122   :  { %1878 = vmatpush3.msra.mxu0 %v1372_v15  ;;  %1832 = vmatprep.subr.mxu1 %v1961_v0 }
 0x123   :  { %1879 = vmatprep.subr.mxu0 %v1961_v0  ;;  %1833 = vmatpush3.msra.mxu1 %v1355_v16 }
 0x124   :  { %1880 = vmatpush3.msra.mxu0 %v1371_v17  ;;  %1768 = vmatprep.mubr.msk.f32.mxu1 %vm1962_vm2, %v1961_v0 }
 0x125   :  { %1815 = vmatprep.mubr.msk.f32.mxu0 %vm1962_vm2, %v1961_v0  ;;  %1834 = vmatprep.subr.mxu1 %v1961_v0 }
 0x126   :  { %1881 = vmatprep.subr.mxu0 %v1961_v0  ;;  %1769 = vmatmul.mubr.f32.gmra.mxu1 %v695_v18 }
 0x127   :  { %1816 = vmatmul.mubr.f32.gmra.mxu0 %v674_v19  ;;  %1835 = vmatpush3.msra.mxu1 %v1354_v20 }
 0x128   :  { %1882 = vmatpush3.msra.mxu0 %v1370_v21  ;;  %1836 = vmatprep.subr.mxu1 %v1961_v0 }
 0x129   :  { %1883 = vmatprep.subr.mxu0 %v1961_v0  ;;  %1837 = vmatpush3.msra.mxu1 %v1353_v22 }
 0x12a   :  { %1884 = vmatpush3.msra.mxu0 %v1369_v23  ;;  %1838 = vmatprep.subr.mxu1 %v1961_v0 }
 0x12b   :  { %1885 = vmatprep.subr.mxu0 %v1961_v0  ;;  %1839 = vmatpush3.msra.mxu1 %v1352_v24 }
 0x12c   :  { %1886 = vmatpush3.msra.mxu0 %v1368_v25  ;;  %1840 = vmatprep.subr.mxu1 %v1961_v0 }
 0x12d   :  { %1887 = vmatprep.subr.mxu0 %v1961_v0  ;;  %1841 = vmatpush3.msra.mxu1 %v1351_v26 }
 0x12e   :  { %1888 = vmatpush3.msra.mxu0 %v1367_v27  ;;  %1842 = vmatprep.subr.mxu1 %v1961_v0 }
 0x12f   :  { %1889 = vmatprep.subr.mxu0 %v1961_v0  ;;  %1843 = vmatpush3.msra.mxu1 %v1350_v29 }
 0x130   :  { %1890 = vmatpush3.msra.mxu0 %v1366_v30  ;;  %1844 = vmatprep.subr.mxu1 %v1961_v0 }
 0x131   :  { %1891 = vmatprep.subr.mxu0 %v1961_v0  ;;  %1845 = vmatpush3.msra.mxu1 %v1349_v32 }
 0x132   :  { %1892 = vmatpush3.msra.mxu0 %v1365_v33  ;;  %1846 = vmatprep.subr.mxu1 %v1961_v0 }
 0x133   :  { %1893 = vmatprep.subr.mxu0 %v1961_v0  ;;  %1847 = vmatpush3.msra.mxu1 %v1348_v34 }
 0x134   :  { %1894 = vmatpush3.msra.mxu0 %v1364_v35  ;;  %1848 = vmatprep.subr.mxu1 %v1961_v0 }
 0x135   :  { %1895 = vmatprep.subr.mxu0 %v1961_v0  ;;  %1849 = vmatpush3.msra.mxu1 %v1347_v37 }
 0x136   :  { %1850 = vmatprep.mubr.msk.f32.mxu1 %vm1962_vm2, %v1961_v0  ;;  %1896 = vmatpush3.msra.mxu0 %v1363_v38 }
 0x137   :  { %1897 = vmatprep.mubr.msk.f32.mxu0 %vm1962_vm2, %v1961_v0  ;;  %1851 = vmatmul.mubr.f32.vlgmr.msra.gmra.mxu1 %v660_v31  ;;  %v1391_v31 = vld [vmem:[%s2666_s3 + $0x260] sm:$0xff] }
 0x138   :  { %1898 = vmatmul.mubr.f32.vlgmr.msra.gmra.mxu0 %v1010_v40  ;;  %1912 = vmatprep.subr.mxu1 %v1961_v0 }
 0x139   :  { %1853 = vmatprep.mubr.msk.f32.mxu1 %vm1962_vm2, %v1961_v0  ;;  %1913 = vmatpush3.msra.mxu1 %v1394_v41 }
 0x13a   :  { %1900 = vmatprep.mubr.msk.f32.mxu0 %vm1962_vm2, %v1961_v0  ;;  %1914 = vmatprep.subr.mxu1 %v1961_v0 }
 0x13b   :  { %1915 = vmatpush3.msra.mxu1 %v1393_v42 }
 0x13c   :  { %1901 = vmatmul.mubr.f32.gmra.mxu0 %v1011_v43  ;;  %1854 = vmatmul.mubr.f32.gmra.mxu1 %v661_v39  ;;  %v895_v39 = vld [vmem:[#allocation3 + $0x12] sm:$0xff] }
 0x13d   :  { %1916 = vmatprep.subr.mxu1 %v1961_v0  ;;  %1856 = vmatprep.mubr.msk.f32.mxu1 %vm1962_vm2, %v1961_v0 }
 0x13e   :  { %1917 = vmatpush3.msra.mxu1 %v1392_v28  ;;  %1903 = vmatprep.mubr.msk.f32.mxu0 %vm1962_vm2, %v1961_v0 }
 0x13f   :  { %1918 = vmatprep.subr.mxu1 %v1961_v0 }
 0x140   :  { %1919 = vmatpush3.msra.mxu1 %v1391_v31  ;;  %1904 = vmatmul.mubr.f32.gmra.mxu0 %v1012_v44 }
 0x141   :  { %1857 = vmatmul.mubr.f32.gmra.mxu1 %v895_v39  ;;  %1920 = vmatprep.subr.mxu1 %v1961_v0 }
 0x142   :  { %1921 = vmatpush3.msra.mxu1 %v1390_v36  ;;  %1859 = vmatprep.mubr.msk.f32.mxu1 %vm1962_vm2, %v1961_v0 }
 0x143   :  { %1922 = vmatprep.subr.mxu1 %v1961_v0  ;;  %1906 = vmatprep.mubr.msk.f32.mxu0 %vm1962_vm2, %v1961_v0 }
 0x144   :  { %1923 = vmatpush3.msra.mxu1 %v1389_v45  ;;  %1907 = vmatmul.mubr.f32.gmra.mxu0 %v1013_v46 }
 0x145   :  { %1860 = vmatmul.mubr.f32.gmra.mxu1 %v663_v58  ;;  %1924 = vmatprep.subr.mxu1 %v1961_v0  ;;  %v1379_v58 = vld [vmem:[%s2666_s3 + $0x200] sm:$0xff] }
 0x146   :  { %1925 = vmatpush3.msra.mxu1 %v1388_v47  ;;  %1862 = vmatprep.mubr.msk.f32.mxu1 %vm1962_vm2, %v1961_v0  ;;  %v1395_v47 = vld [vmem:[%s2668_s4] ss:$0 sm:$0xff] }
 0x147   :  { %1926 = vmatprep.subr.mxu1 %v1961_v0  ;;  %1909 = vmatprep.mubr.msk.f32.mxu0 %vm1962_vm2, %v1961_v0 }
 0x148   :  { %1927 = vmatpush3.msra.mxu1 %v1387_v48  ;;  %1910 = vmatmul.mubr.f32.gmra.mxu0 %v1014_v49 }
 0x149   :  { %1863 = vmatmul.mubr.f32.gmra.mxu1 %v897_v51  ;;  %1928 = vmatprep.subr.mxu1 %v1961_v0 }
 0x14a   :  { %1929 = vmatpush3.msra.mxu1 %v1386_v50  ;;  %1944 = vmatprep.mubr.msk.f32.mxu1 %vm1962_vm2, %v1961_v0 }
 0x14b   :  { %1930 = vmatprep.subr.mxu1 %v1961_v0 }
 0x14c   :  { %1931 = vmatpush3.msra.mxu1 %v1385_v52 }
 0x14d   :  { %1932 = vmatprep.subr.mxu1 %v1961_v0 }
 0x14e   :  { %1933 = vmatpush3.msra.mxu1 %v1384_v53 }
 0x14f   :  { %1934 = vmatprep.subr.mxu1 %v1961_v0 }
 0x150   :  { %1935 = vmatpush3.msra.mxu1 %v1383_v54 }
 0x151   :  { %1936 = vmatprep.subr.mxu1 %v1961_v0 }
 0x152   :  { %1937 = vmatpush3.msra.mxu1 %v1382_v55 }
 0x153   :  { %1938 = vmatprep.subr.mxu1 %v1961_v0 }
 0x154   :  { %1939 = vmatpush3.msra.mxu1 %v1381_v56 }
 0x155   :  { %1940 = vmatprep.subr.mxu1 %v1961_v0 }
 0x156   :  { %1941 = vmatpush3.msra.mxu1 %v1380_v57 }
 0x157   :  { %1942 = vmatprep.subr.mxu1 %v1961_v0 }
 0x158   :  { %1943 = vmatpush3.msra.mxu1 %v1379_v58 }
 0x159   :  { %1945 = vmatmul.mubr.f32.vlgmr.msra.gmra.mxu1 %v1127_v59 }
 0x15a   :  { %1947 = vmatprep.mubr.msk.f32.mxu1 %vm1962_vm2, %v1961_v0 }
 0x15d   :  { %1948 = vmatmul.mubr.f32.gmra.mxu1 %v1128_v60 }
 0x15e   :  { %1950 = vmatprep.mubr.msk.f32.mxu1 %vm1962_vm2, %v1961_v0 }
 0x161   :  { %1951 = vmatmul.mubr.f32.gmra.mxu1 %v1129_v61 }
 0x162   :  { %1953 = vmatprep.mubr.msk.f32.mxu1 %vm1962_vm2, %v1961_v0 }
 0x165   :  { %1954 = vmatmul.mubr.f32.gmra.mxu1 %v1130_v62 }
 0x166   :  { %1956 = vmatprep.mubr.msk.f32.mxu1 %vm1962_vm2, %v1961_v0 }
 0x169   :  { %1957 = vmatmul.mubr.f32.gmra.mxu1 %v1131_v63 }
 0x1ce   :  { %v779_v1 = vpop.f32.mrf.mxu1 }
 0x1cf   :  { %v869_v2 = vpop.f32.mrf.mxu0 }
 0x1d0   :  { %v870_v3 = vadd.f32 %v869_v2, %v779_v1  ;;  %v1758_v4 = vpop.f32.mrf.mxu1 }
 0x1d1   :  { %v1805_v5 = vpop.f32.mrf.mxu0 }
 0x1d4   :  { %v784_v6 = vpop.f32.mrf.mxu1 }
 0x1d5   :  { %v874_v7 = vpop.f32.mrf.mxu0 }
 0x1d6   :  { %v875_v8 = vadd.f32 %v874_v7, %v784_v6  ;;  %v1761_v9 = vpop.f32.mrf.mxu1 }
 0x1d7   :  { %v1808_v10 = vpop.f32.mrf.mxu0 }
 0x1da   :  { %v789_v11 = vpop.f32.mrf.mxu1 }
 0x1db   :  { %v879_v12 = vpop.f32.mrf.mxu0 }
 0x1dc   :  { %v880_v13 = vadd.f32 %v879_v12, %v789_v11  ;;  %v1764_v14 = vpop.f32.mrf.mxu1 }
 0x1dd   :  { %v1811_v15 = vpop.f32.mrf.mxu0 }
 0x1e0   :  { %v794_v16 = vpop.f32.mrf.mxu1 }
 0x1e1   :  { %v884_v17 = vpop.f32.mrf.mxu0 }
 0x1e2   :  { %v1767_v0 = vpop.f32.mrf.mxu1  ;;  %v885_v54 = vadd.f32 %v884_v17, %v794_v16 }
 0x1e3   :  { %v1814_v18 = vpop.f32.mrf.mxu0 }
 0x1e6   :  { %v799_v19 = vpop.f32.mrf.mxu1 }
 0x1e7   :  { %v889_v20 = vpop.f32.mrf.mxu0 }
 0x1e8   :  { %v1770_v21 = vpop.f32.mrf.mxu1  ;;  %v890_v62 = vadd.f32 %v889_v20, %v799_v19 }
 0x1e9   :  { %v1817_v22 = vpop.f32.mrf.mxu0 }
 0x1f7   :  { %v981_v23 = vpop.f32.mrf.mxu1 }
 0x1f8   :  { %v1098_v24 = vpop.f32.mrf.mxu0  ;;  %v1005_v36 = vadd.f32 %v981_v23, %v870_v3 }
 0x1f9   :  { %v1852_v25 = vpop.f32.mrf.mxu1 }
 0x1fa   :  { %v1899_v26 = vpop.f32.mrf.mxu0  ;;  %v1122_v39 = vadd.f32 %v1098_v24, %v1005_v36 }
 0x1fc   :  { %v1103_v27 = vpop.f32.mrf.mxu0  ;;  %v986_v29 = vpop.f32.mrf.mxu1 }
 0x1fd   :  { %v1006_v45 = vadd.f32 %v986_v29, %v875_v8 }
 0x1fe   :  { %v1902_v30 = vpop.f32.mrf.mxu0  ;;  %v1855_v32 = vpop.f32.mrf.mxu1 }
 0x1ff   :  { %v1123_v50 = vadd.f32 %v1103_v27, %v1006_v45 }
 0x200   :  { %v1108_v33 = vpop.f32.mrf.mxu0 }
 0x201   :  { %v991_v34 = vpop.f32.mrf.mxu1 }
 0x202   :  { %v1905_v35 = vpop.f32.mrf.mxu0  ;;  %v1007_v51 = vadd.f32 %v991_v34, %v880_v13 }
 0x203   :  { %v1858_v37 = vpop.f32.mrf.mxu1 }
 0x204   :  { %v1113_v38 = vpop.f32.mrf.mxu0  ;;  %v1124_v58 = vadd.f32 %v1108_v33, %v1007_v51 }
 0x205   :  { %v996_v40 = vpop.f32.mrf.mxu1 }
 0x206   :  { %v1908_v41 = vpop.f32.mrf.mxu0  ;;  %v1008_v59 = vadd.f32 %v996_v40, %v885_v54 }
 0x207   :  { %v1861_v42 = vpop.f32.mrf.mxu1 }
 0x208   :  { %v1118_v43 = vpop.f32.mrf.mxu0  ;;  %v1125_v3 = vadd.f32 %v1113_v38, %v1008_v59 }
 0x209   :  { %v1001_v28 = vpop.f32.mrf.mxu1 }
 0x20a   :  { %v1911_v31 = vpop.f32.mrf.mxu0  ;;  %v1009_v4 = vadd.f32 %v1001_v28, %v890_v62 }
 0x20b   :  { %v1864_v44 = vpop.f32.mrf.mxu1 }
 0x20c   :  { %v1126_v10 = vadd.f32 %v1118_v43, %v1009_v4 }
 0x219   :  { %v1215_v46 = vpop.f32.mrf.mxu1 }
 0x21a   :  { %v1239_v48 = vadd.f32 %v1215_v46, %v1122_v39 }
 0x21b   :  { %v1946_v49 = vpop.f32.mrf.mxu1 }
 0x21c   :  { %v1251_v52 = vadd.f32 %v1395_v47, %v1239_v48 }
 0x21d   :  { %v1220_v53 = vpop.f32.mrf.mxu1 }
 0x21e   :  { %v1256_v55 = vmax.f32 %v1251_v52, 0.0  ;;  %v1240_v56 = vadd.f32 %v1220_v53, %v1123_v50 }
 0x21f   :  { %v1949_v57 = vpop.f32.mrf.mxu1 }
 0x220   :  { %1261 = vst [vmem:[%s2669_s5] sm:$0xff] %v1256_v55  ;;  %v1252_v60 = vadd.f32 %v1395_v47, %v1240_v56 }
 0x221   :  { %v1225_v61 = vpop.f32.mrf.mxu1 }
 0x222   :  { %v1257_v63 = vmax.f32 %v1252_v60, 0.0  ;;  %v1241_v1 = vadd.f32 %v1225_v61, %v1124_v58 }
 0x223   :  { %v1952_v2 = vpop.f32.mrf.mxu1 }
 0x224   :  { %1262 = vst [vmem:[%s2669_s5 + $0x8] sm:$0xff] %v1257_v63  ;;  %v1253_v5 = vadd.f32 %v1395_v47, %v1241_v1 }
 0x225   :  { %v1230_v6 = vpop.f32.mrf.mxu1 }
 0x226   :  { %v1258_v7 = vmax.f32 %v1253_v5, 0.0  ;;  %v1242_v8 = vadd.f32 %v1230_v6, %v1125_v3 }
 0x227   :  { %v1955_v9 = vpop.f32.mrf.mxu1 }
 0x228   :  { %1396 = vst [vmem:[%s2669_s5 + $0xc] sm:$0xf0] %v1258_v7  ;;  %v1254_v11 = vadd.f32 %v1395_v47, %v1242_v8 }
 0x229   :  { %v1235_v12 = vpop.f32.mrf.mxu1 }
 0x22a   :  { %v1259_v13 = vmax.f32 %v1254_v11, 0.0  ;;  %v1243_v14 = vadd.f32 %v1235_v12, %v1126_v10 }
 0x22b   :  { %v1958_v15 = vpop.f32.mrf.mxu1 }
 0x22c   :  { %1397 = vst [vmem:[%s2669_s5 + $0x14] sm:$0xff] %v1259_v13  ;;  %v1255_v16 = vadd.f32 %v1395_v47, %v1243_v14 }
 0x22e   :  { %v1260_v17 = vmax.f32 %v1255_v16, 0.0 }
 0x230   :  { %1398 = vst [vmem:[%s2669_s5 + $0x1c] sm:$0xf] %v1260_v17 }

</bundles_post_ra>
